<compile_context>
chip_gen: v7x
topology: tpu7x:2x2x1
jax: 0.10.0
libtpu: 0.0.40
codegen_flags: <defaults>
</compile_context>

<pallas_src>
import functools

import jax
import jax.numpy as jnp
from jax import lax
from jax.experimental import pallas as pl
from jax.experimental.pallas import tpu as pltpu


def _round_up(x, m):
    return ((x + m - 1) // m) * m


def _tpu_vmem_bytes():
    try:
        return int(pltpu.get_tpu_info().vmem_capacity_bytes)
    except Exception:
        return 64 * 1024 * 1024   # conservative fallback (treat as a 64 MiB part)


_VMEM_CAP = _tpu_vmem_bytes()
if _VMEM_CAP >= 96 * 1024 * 1024:            # v5e / v6e: 128 MiB VMEM per core
    _VMEM_LIMIT = 96 * 1024 * 1024
    _MAX_COL_TILE = 512
else:                                        # v7x: 64 MiB VMEM per core
    _VMEM_LIMIT = 48 * 1024 * 1024
    _MAX_COL_TILE = 256


def _col_tiling(hw, max_tile=_MAX_COL_TILE):
    """Pad the column (spatial) axis to a 128 multiple and pick a lane-aligned tile."""
    if hw <= 128:
        return hw, hw                          # single full-extent block
    hw_pad = _round_up(hw, 128)
    tile = 128
    for cand in (512, 384, 256, 128):
        if cand <= max_tile and hw_pad % cand == 0:
            tile = cand
            break
    return hw_pad, tile


def _pad_cols(x, hw_pad):
    hw = x.shape[-1]
    if hw_pad == hw:
        return x
    return jnp.pad(x, ((0, 0),) * (x.ndim - 1) + ((0, hw_pad - hw),))


def _block_spec(block_shape, index_map, resident=False):
    """BlockSpec; resident (constant index_map) operands request single buffering."""
    if resident:
        try:
            return pl.BlockSpec(block_shape, index_map, pipeline_mode=pl.Buffered(1))
        except Exception:
            pass   # older API without pipeline_mode -> default double buffering
    return pl.BlockSpec(block_shape, index_map)


# ----------------------------------------------------------------------------
# Pallas kernels (the hot paths). bf16 operands / outputs, f32 math inside.
# ----------------------------------------------------------------------------

def _conv1x1_prelu_kernel(x_ref, w_ref, b_ref, a_ref, o_ref):
    """o[0] = PReLU(W @ x + b); output lane axis = spatial tile (lane-dense)."""
    acc = jnp.dot(w_ref[...], x_ref[0], preferred_element_type=jnp.float32)  # [Cout, thw]
    acc = acc + b_ref[...]
    o_ref[0] = jnp.where(acc >= 0.0, acc, a_ref[...] * acc).astype(o_ref.dtype)


def _nla_kernel(x1_ref, x2_ref, xa_ref, o_ref):
    """Non-local attention, channel-major, tiled over the query axis.

    Score is computed transposed ([HW, tq]) so the PV matmul is a plain
    [C,HW] x [HW,tq] MXU matmul with no transpose of the probability matrix.
    """
    x1 = x1_ref[0]                          # [Cr, tq]  bf16 queries
    x2 = x2_ref[0]                          # [Cr, HW]  bf16 keys (resident)
    xa = xa_ref[0]                          # [C,  HW]  bf16 values (resident)
    # s[k, q] = sum_c x2[c, k] * x1[c, q]
    s = lax.dot_general(x2, x1, (((0,), (0,)), ((), ())),
                        preferred_element_type=jnp.float32)              # [HW, tq]
    m = jnp.max(s, axis=0, keepdims=True)
    e = jnp.exp(s - m)
    p = e * pl.reciprocal(jnp.sum(e, axis=0, keepdims=True), approx=True)
    # o[c, q] = sum_k xa[c, k] * p[k, q]
    o_ref[0] = jnp.dot(xa, p.astype(jnp.bfloat16),
                       preferred_element_type=jnp.float32).astype(o_ref.dtype)


def _csa_kernel(a_ref, wn_ref, wrt_ref, o_ref, *, softmax_scale):
    """Cross-scale attention core, tiled over output columns (HW).

    a   : [K1, thw] query 3x3 patches of conv_match_1(x) ('same' padded)
    wn  : [L,  K1]  L2-normalized key patches (normalized in the wrapper)
    wrt : [K2, L ]  reconstruction 6x6 patches of conv_assembly(x) (transposed)
    out : [K2, thw] = Wr^T @ softmax_L(scale * Wn @ A)
    """
    a = a_ref[0]                                                     # [K1, thw] bf16
    s = jnp.dot(wn_ref[0], a, preferred_element_type=jnp.float32) * softmax_scale
    m = jnp.max(s, axis=0, keepdims=True)
    e = jnp.exp(s - m)
    prob = e * pl.reciprocal(jnp.sum(e, axis=0, keepdims=True), approx=True)  # softmax over L
    o_ref[0] = jnp.dot(wrt_ref[0], prob.astype(jnp.bfloat16),
                       preferred_element_type=jnp.float32).astype(o_ref.dtype)  # [K2, thw]


# ----------------------------------------------------------------------------
# Fused 1x1-conv GEMM wrapper (lane-dense, bf16 in / bf16 out, f32 accumulate)
# ----------------------------------------------------------------------------

def conv1x1_prelu_fused(x, weights, biases, alphas):
    """Several 1x1 convs + PReLU over the same input as ONE Pallas GEMM.

    x: [N, C, H, W]; weights[i]: [Cout_i, C, 1, 1]; biases[i]: [Cout_i];
    alphas[i]: scalar PReLU slope (1.0 disables activation).
    Returns a list of channel-major maps [N, Cout_i, H*W] (bfloat16).
    """
    n, c, h, w = x.shape
    hw = h * w
    w_cat = jnp.concatenate([wi.reshape(wi.shape[0], c) for wi in weights], axis=0)
    cout = w_cat.shape[0]
    b_cat = jnp.concatenate(list(biases), axis=0).reshape(cout, 1).astype(jnp.float32)
    a_cat = jnp.concatenate(
        [jnp.full((wi.shape[0], 1), ai, jnp.float32) for wi, ai in zip(weights, alphas)],
        axis=0)

    xm = x.reshape(n, c, hw).astype(jnp.bfloat16)
    wb = w_cat.astype(jnp.bfloat16)

    hw_pad, thw = _col_tiling(hw)
    xm = _pad_cols(xm, hw_pad)

    out = pl.pallas_call(
        _conv1x1_prelu_kernel,
        out_shape=jax.ShapeDtypeStruct((n, cout, hw_pad), jnp.bfloat16),
        grid=(n, hw_pad // thw),
        in_specs=[
            _block_spec((1, c, thw), lambda i, j: (i, 0, j)),
            _block_spec((cout, c), lambda i, j: (0, 0), resident=True),
            _block_spec((cout, 1), lambda i, j: (0, 0), resident=True),
            _block_spec((cout, 1), lambda i, j: (0, 0), resident=True),
        ],
        out_specs=pl.BlockSpec((1, cout, thw), lambda i, j: (i, 0, j)),
        compiler_params=pltpu.CompilerParams(
            dimension_semantics=("parallel", "parallel"),
            vmem_limit_bytes=_VMEM_LIMIT),
    )(xm, wb, b_cat, a_cat)

    out = out[:, :, :hw]
    splits, off = [], 0
    for wi in weights:
        co = wi.shape[0]
        splits.append(out[:, off:off + co, :])
        off += co
    return splits


# ----------------------------------------------------------------------------
# Spatial convs (lax.conv, bf16 operands / f32 accumulate) + patch glue for CSA
# ----------------------------------------------------------------------------

def conv2d_prelu(x, w, b, stride, pad, alpha):
    out = lax.conv_general_dilated(
        x.astype(jnp.bfloat16), w.astype(jnp.bfloat16),
        window_strides=(stride, stride),
        padding=((pad, pad), (pad, pad)),
        dimension_numbers=('NCHW', 'OIHW', 'NCHW'),
        preferred_element_type=jnp.float32)
    out = out + b.reshape(1, -1, 1, 1)
    return jnp.where(out >= 0.0, out, alpha * out)


def conv_transpose2d_prelu(x, w, b, stride, pad, alpha):
    """PyTorch ConvTranspose2d (weight [Cin, Cout, k, k]) + PReLU via input dilation."""
    k = w.shape[2]
    w_eq = jnp.flip(w, axis=(2, 3)).transpose(1, 0, 2, 3)          # [Cout, Cin, k, k]
    out = lax.conv_general_dilated(
        x.astype(jnp.bfloat16), w_eq.astype(jnp.bfloat16),
        window_strides=(1, 1),
        padding=((k - 1 - pad, k - 1 - pad), (k - 1 - pad, k - 1 - pad)),
        lhs_dilation=(stride, stride),
        dimension_numbers=('NCHW', 'OIHW', 'NCHW'),
        preferred_element_type=jnp.float32)
    out = out + b.reshape(1, -1, 1, 1)
    return jnp.where(out >= 0.0, out, alpha * out)


def _same_pad(h, w, k, s):
    oh = (h + s - 1) // s
    ow = (w + s - 1) // s
    ph = max(0, (oh - 1) * s + k - h)
    pw = max(0, (ow - 1) * s + k - w)
    return (ph // 2, ph - ph // 2), (pw // 2, pw - pw // 2)


def _unfold(x, k, stride, pads):
    """x: [N,C,H,W] -> ([N, C, k*k, L], oh, ow) with torch.nn.Unfold ordering."""
    (pt, pb), (pleft, pright) = pads
    xp = jnp.pad(x, ((0, 0), (0, 0), (pt, pb), (pleft, pright)))
    n, c, hp, wp = xp.shape
    oh = (hp - k) // stride + 1
    ow = (wp - k) // stride + 1
    cols = []
    for ky in range(k):
        for kx in range(k):
            cols.append(xp[:, :, ky:ky + stride * (oh - 1) + 1:stride,
                           kx:kx + stride * (ow - 1) + 1:stride])
    p = jnp.stack(cols, axis=2)                      # [N, C, k*k, oh, ow]
    return p.reshape(n, c, k * k, oh * ow), oh, ow


def _fold_conv(z, c, k, stride, pad, grid_h, grid_w):
    """col2im (adjoint of unfold) as ONE grouped transposed conv with a one-hot
    kernel -> runs on the MXU instead of k*k serialized full-tensor scatter-adds.

    z: [N, C*k*k, grid_h*grid_w] -> [N, C, (grid_h-1)*stride + k - 2*pad, ...]
    """
    n = z.shape[0]
    z4 = z.reshape(n, c * k * k, grid_h, grid_w).astype(jnp.bfloat16)
    eye = jnp.eye(k * k, dtype=jnp.bfloat16).reshape(k * k, k, k)
    eye = jnp.flip(eye, axis=(1, 2))                           # rot180 for lhs-dilated conv
    w_fold = jnp.broadcast_to(eye[None], (c, k * k, k, k))     # one identity block per group
    return lax.conv_general_dilated(
        z4, w_fold, window_strides=(1, 1),
        padding=((k - 1 - pad, k - 1 - pad), (k - 1 - pad, k - 1 - pad)),
        lhs_dilation=(stride, stride),
        dimension_numbers=('NCHW', 'OIHW', 'NCHW'),
        feature_group_count=c,
        preferred_element_type=jnp.float32)


# ----------------------------------------------------------------------------
# Attention modules
# ----------------------------------------------------------------------------

def non_local_attention(x, p):
    n, c, h, w = x.shape
    hw = h * w
    # Fused 1x1 convs: conv_match1 (C/2), conv_match2 (C/2), conv_assembly (C).
    x1m, x2m, xam = conv1x1_prelu_fused(
        x,
        [p['m1_w'], p['m2_w'], p['as_w']],
        [p['m1_b'], p['m2_b'], p['as_b']],
        [p['m1_a'], p['m2_a'], p['as_a']])
    cr = x1m.shape[1]

    hw_pad, tq = _col_tiling(hw)
    x1q = _pad_cols(x1m, hw_pad)       # pad only the query axis; keys/values stay exact

    # TODO(synk): flash-style key tiling (online softmax over an HW-key grid axis)
    # for very large resolutions; current form keeps K/V resident per batch element.
    out = pl.pallas_call(
        _nla_kernel,
        out_shape=jax.ShapeDtypeStruct((n, c, hw_pad), jnp.bfloat16),
        grid=(n, hw_pad // tq),
        in_specs=[
            _block_spec((1, cr, tq), lambda i, j: (i, 0, j)),                  # queries (tiled)
            _block_spec((1, cr, hw), lambda i, j: (i, 0, 0), resident=True),   # keys
            _block_spec((1, c, hw), lambda i, j: (i, 0, 0), resident=True),    # values
        ],
        out_specs=pl.BlockSpec((1, c, tq), lambda i, j: (i, 0, j)),
        compiler_params=pltpu.CompilerParams(
            dimension_semantics=("parallel", "parallel"),
            vmem_limit_bytes=_VMEM_LIMIT),
    )(x1q, x2m, xam)
    out = out[:, :, :hw]
    return out.reshape(n, c, h, w)


def cross_scale_attention(x, p, scale=2, ksize=3, softmax_scale=10.0):
    n, c, h, w = x.shape
    hw = h * w
    kernel = scale * ksize                                             # 6

    # Fused 1x1 convs on x: conv_match_1 (C/2) + conv_assembly (C).
    match1_m, embed_m = conv1x1_prelu_fused(
        x, [p['m1_w'], p['as_w']], [p['m1_b'], p['as_b']], [p['m1_a'], p['as_a']])
    cr = match1_m.shape[1]
    match1 = match1_m.reshape(n, cr, h, w)
    embed_w = embed_m.reshape(n, c, h, w)

    # Reconstruction patches of embed_w (kernel 6, stride 2, 'same').
    raw_cols, _, _ = _unfold(embed_w, kernel, scale, _same_pad(h, w, kernel, scale))
    l = raw_cols.shape[-1]
    k2 = c * kernel * kernel
    wr_t = raw_cols.reshape(n, k2, l).astype(jnp.bfloat16)             # Wr^T per batch
    # TODO(synk): tile K2 (Wr^T rows) as an extra grid axis for very large C so the
    # reconstruction-patch matrix need not be fully resident on 64 MiB parts.

    # Reference = bilinear 1/2 downsample (exact 0.5, align_corners=False == 2x2 avg pool).
    ref_in = x.reshape(n, c, h // scale, scale, w // scale, scale).mean(axis=(3, 5))
    (ref_m,) = conv1x1_prelu_fused(ref_in, [p['m2_w']], [p['m2_b']], [p['m2_a']])
    ref = ref_m.reshape(n, cr, h // scale, w // scale)
    w_cols, _, _ = _unfold(ref, ksize, 1, _same_pad(h // scale, w // scale, ksize, 1))
    k1 = cr * ksize * ksize
    wp = w_cols.reshape(n, k1, l).transpose(0, 2, 1).astype(jnp.float32)    # [N, L, K1]
    # Patch L2-normalization in the wrapper (tiny O(L*K1) op); clamp == escape_NaN.
    ss = jnp.sum(wp * wp, axis=2, keepdims=True)
    wn = (wp * lax.rsqrt(jnp.maximum(ss, 1e-8))).astype(jnp.bfloat16)

    # Query patches of match1 ('same' pad, stride 1).
    a_cols, _, _ = _unfold(match1, ksize, 1, _same_pad(h, w, ksize, 1))
    amat = a_cols.reshape(n, k1, hw).astype(jnp.bfloat16)               # [N, K1, HW]

    hw_pad, thw = _col_tiling(hw)
    amat = _pad_cols(amat, hw_pad)

    z = pl.pallas_call(
        functools.partial(_csa_kernel, softmax_scale=softmax_scale),
        out_shape=jax.ShapeDtypeStruct((n, k2, hw_pad), jnp.bfloat16),
        grid=(n, hw_pad // thw),
        in_specs=[
            _block_spec((1, k1, thw), lambda i, j: (i, 0, j)),                 # query cols (tiled)
            _block_spec((1, l, k1), lambda i, j: (i, 0, 0), resident=True),    # normalized keys
            _block_spec((1, k2, l), lambda i, j: (i, 0, 0), resident=True),    # recon patches
        ],
        out_specs=pl.BlockSpec((1, k2, thw), lambda i, j: (i, 0, j)),
        compiler_params=pltpu.CompilerParams(
            dimension_semantics=("parallel", "parallel"),
            vmem_limit_bytes=_VMEM_LIMIT),
    )(amat, wn, wr_t)
    z = z[:, :, :hw]

    # conv_transpose2d(yi, raw_patches, stride=scale, padding=scale) == fold, then /6.
    out = _fold_conv(z, c, kernel, scale, scale, h, w)
    return out / 6.0


# ----------------------------------------------------------------------------
# MultisourceProjection / RecurrentProjection (scale=2 configuration)
# ----------------------------------------------------------------------------

def multi_source_projection(x, p):
    down = non_local_attention(x, p['nla'])
    down_map = conv_transpose2d_prelu(down, p['up_w'], p['up_b'], 2, 2, p['up_a'])
    up_map = cross_scale_attention(x, p['csa'], scale=2, ksize=3)
    err_in = up_map - down_map
    r = conv2d_prelu(err_in, p['enc1_w'], p['enc1_b'], 1, 1, p['enc_a'])
    r = conv2d_prelu(r, p['enc2_w'], p['enc2_b'], 1, 1, 1.0)   # no activation
    err = err_in + r                                           # ResBlock, res_scale=1
    return down_map + err


@jax.jit
def recurrent_projection(x, p):
    # scale == 2 path of RecurrentProjection.forward
    # TODO(synk): scale==3 / scale==4 branches (different kernel sizes, second
    # MultisourceProjection) are not instantiated for the default scale=2 config.
    x_up = multi_source_projection(x, p['msp'])
    x_down = conv2d_prelu(x_up, p['ds1_w'], p['ds1_b'], 2, 2, p['ds1_a'])
    error_up = conv_transpose2d_prelu(x - x_down, p['ee_w'], p['ee_b'], 2, 2, p['ee_a'])
    h_estimate = x_up + error_up
    x_d2 = conv2d_prelu(h_estimate, p['ds2_w'], p['ds2_b'], 2, 2, p['ds2_a'])
    x_final = conv2d_prelu(x_d2, p['pc_w'], p['pc_b'], 1, 1, p['pc_a'])
    return x_final, h_estimate


# ----------------------------------------------------------------------------
# Deterministic parameter initialization (synthetic weights, PReLU alpha=0.25)
# ----------------------------------------------------------------------------

def _conv_params(key, cout, cin, k):
    kw, kb = jax.random.split(key)
    w = jax.random.normal(kw, (cout, cin, k, k), jnp.float32) / jnp.sqrt(cin * k * k)
    b = 0.01 * jax.random.normal(kb, (cout,), jnp.float32)
    return w, b


def _attention_params(key, c):
    k1, k2, k3 = jax.random.split(key, 3)
    m1w, m1b = _conv_params(k1, c // 2, c, 1)
    m2w, m2b = _conv_params(k2, c // 2, c, 1)
    asw, asb = _conv_params(k3, c, c, 1)
    return dict(m1_w=m1w, m1_b=m1b, m1_a=0.25,
                m2_w=m2w, m2_b=m2b, m2_a=0.25,
                as_w=asw, as_b=asb, as_a=0.25)


def init_params(key, c):
    ks = jax.random.split(key, 10)
    msp = dict(csa=_attention_params(ks[0], c), nla=_attention_params(ks[1], c))
    msp['up_w'], msp['up_b'] = _conv_params(ks[2], c, c, 6)   # deconv [Cin, Cout, 6, 6]
    msp['up_a'] = 0.25
    msp['enc1_w'], msp['enc1_b'] = _conv_params(ks[3], c, c, 3)
    msp['enc_a'] = 0.25
    msp['enc2_w'], msp['enc2_b'] = _conv_params(ks[4], c, c, 3)
    p = dict(msp=msp)
    p['ds1_w'], p['ds1_b'] = _conv_params(ks[5], c, c, 6); p['ds1_a'] = 0.25
    p['ds2_w'], p['ds2_b'] = _conv_params(ks[6], c, c, 6); p['ds2_a'] = 0.25
    p['ee_w'], p['ee_b'] = _conv_params(ks[7], c, c, 6); p['ee_a'] = 0.25
    p['pc_w'], p['pc_b'] = _conv_params(ks[8], c, c, 3); p['pc_a'] = 0.25
    return p


if __name__ == "__main__":
    key = jax.random.PRNGKey(0)
    kx, kp = jax.random.split(key)
    N, C, H, W = 2, 4, 16, 16
    x = jax.random.normal(kx, (N, C, H, W), jnp.float32)
    params = init_params(kp, C)

    x_final, h_estimate = recurrent_projection(x, params)
    jax.block_until_ready((x_final, h_estimate))

    assert x_final.shape == (N, C, H, W)
    assert h_estimate.shape == (N, C, 2 * H, 2 * W)
    assert bool(jnp.all(jnp.isfinite(x_final))) and bool(jnp.all(jnp.isfinite(h_estimate)))
    print("KERNEL_OK")
</pallas_src>

<mosaic_0001>
module attributes {stable_mosaic.version = 11 : i64} {
  func.func @_conv1x1_prelu_kernel(%arg0: i32, %arg1: i32, %arg2: memref<1x4x256xbf16, #tpu.memory_space<vmem>>, %arg3: memref<6x4xbf16, #tpu.memory_space<vmem>>, %arg4: memref<6x1xf32, #tpu.memory_space<vmem>>, %arg5: memref<6x1xf32, #tpu.memory_space<vmem>>, %arg6: memref<1x6x256xbf16, #tpu.memory_space<vmem>>) attributes {dimension_semantics = [#tpu.dimension_semantics<parallel>, #tpu.dimension_semantics<parallel>], iteration_bounds = array<i64: 2, 1>, scalar_prefetch = 0 : i64, scratch_operands = 0 : i64, tpu.core_type = #tpu.core_type<tc>, window_params = [{transform_indices = @transform_0, window_bounds = array<i64: 1, 4, 256>}, {pipeline_mode = #tpu.pipeline_mode<synchronous>, transform_indices = @transform_1, window_bounds = array<i64: 6, 4>}, {pipeline_mode = #tpu.pipeline_mode<synchronous>, transform_indices = @transform_2, window_bounds = array<i64: 6, 1>}, {pipeline_mode = #tpu.pipeline_mode<synchronous>, transform_indices = @transform_3, window_bounds = array<i64: 6, 1>}, {transform_indices = @transform_4, window_bounds = array<i64: 1, 6, 256>}]} {
    %c0 = arith.constant 0 : index
    %c0_0 = arith.constant 0 : index
    %0 = vector.load %arg3[%c0, %c0_0] : memref<6x4xbf16, #tpu.memory_space<vmem>>, vector<6x4xbf16>
    %c0_1 = arith.constant 0 : index
    %c0_2 = arith.constant 0 : index
    %c0_3 = arith.constant 0 : index
    %1 = vector.load %arg2[%c0_1, %c0_2, %c0_3] : memref<1x4x256xbf16, #tpu.memory_space<vmem>>, vector<1x4x256xbf16>
    %2 = vector.shape_cast %1 : vector<1x4x256xbf16> to vector<4x256xbf16>
    %cst = arith.constant dense<0.000000e+00> : vector<6x256xf32>
    %3 = tpu.matmul %0, %2, %cst {dimension_numbers = #tpu.dot_dimension_numbers<[1], [0], [0], [1], [0, 0, 1, 1], [], []>} : vector<6x4xbf16>, vector<4x256xbf16>, vector<6x256xf32> -> vector<6x256xf32>
    %c0_4 = arith.constant 0 : index
    %c0_5 = arith.constant 0 : index
    %4 = vector.load %arg4[%c0_4, %c0_5] : memref<6x1xf32, #tpu.memory_space<vmem>>, vector<6x1xf32>
    %5 = vector.broadcast %4 : vector<6x1xf32> to vector<6x256xf32>
    %6 = arith.addf %3, %5 : vector<6x256xf32>
    %cst_6 = arith.constant 0.000000e+00 : f32
    %7 = vector.broadcast %cst_6 : f32 to vector<6x256xf32>
    %8 = arith.cmpf oge, %6, %7 : vector<6x256xf32>
    %c0_7 = arith.constant 0 : index
    %c0_8 = arith.constant 0 : index
    %9 = vector.load %arg5[%c0_7, %c0_8] : memref<6x1xf32, #tpu.memory_space<vmem>>, vector<6x1xf32>
    %10 = vector.broadcast %9 : vector<6x1xf32> to vector<6x256xf32>
    %11 = arith.mulf %10, %6 : vector<6x256xf32>
    %12 = arith.select %8, %6, %11 : vector<6x256xi1>, vector<6x256xf32>
    %13 = arith.truncf %12 : vector<6x256xf32> to vector<6x256xbf16>
    %c0_9 = arith.constant 0 : index
    %c0_10 = arith.constant 0 : index
    %c0_11 = arith.constant 0 : index
    %14 = vector.load %arg6[%c0_9, %c0_10, %c0_11] : memref<1x6x256xbf16, #tpu.memory_space<vmem>>, vector<1x6x256xbf16>
    %15 = vector.shape_cast %14 : vector<1x6x256xbf16> to vector<6x256xbf16>
    %16 = vector.shape_cast %13 : vector<6x256xbf16> to vector<1x6x256xbf16>
    tpu.vector_store %arg6[%c0_9, %c0_10, %c0_11], %16 {strides = array<i32>} : memref<1x6x256xbf16, #tpu.memory_space<vmem>>, vector<1x6x256xbf16>,
    return
  }
  func.func @transform_0(%arg0: i32, %arg1: i32) -> (i32, i32, i32) {
    %c0_i32 = arith.constant 0 : i32
    %c0_i32_0 = arith.constant 0 : i32
    return %arg0, %c0_i32, %arg1 : i32, i32, i32
  }
  func.func @transform_1(%arg0: i32, %arg1: i32) -> (i32, i32) {
    %c0_i32 = arith.constant 0 : i32
    %c0_i32_0 = arith.constant 0 : i32
    %c0_i32_1 = arith.constant 0 : i32
    return %c0_i32, %c0_i32_0 : i32, i32
  }
  func.func @transform_2(%arg0: i32, %arg1: i32) -> (i32, i32) {
    %c0_i32 = arith.constant 0 : i32
    %c0_i32_0 = arith.constant 0 : i32
    %c0_i32_1 = arith.constant 0 : i32
    return %c0_i32, %c0_i32_0 : i32, i32
  }
  func.func @transform_3(%arg0: i32, %arg1: i32) -> (i32, i32) {
    %c0_i32 = arith.constant 0 : i32
    %c0_i32_0 = arith.constant 0 : i32
    %c0_i32_1 = arith.constant 0 : i32
    return %c0_i32, %c0_i32_0 : i32, i32
  }
  func.func @transform_4(%arg0: i32, %arg1: i32) -> (i32, i32, i32) {
    %c0_i32 = arith.constant 0 : i32
    %c0_i32_0 = arith.constant 0 : i32
    return %arg0, %c0_i32, %arg1 : i32, i32, i32
  }
}

module attributes {stable_mosaic.version = 11 : i64} {
  func.func @_conv1x1_prelu_kernel(%arg0: i32, %arg1: i32, %arg2: memref<1x4x64xbf16, #tpu.memory_space<vmem>>, %arg3: memref<2x4xbf16, #tpu.memory_space<vmem>>, %arg4: memref<2x1xf32, #tpu.memory_space<vmem>>, %arg5: memref<2x1xf32, #tpu.memory_space<vmem>>, %arg6: memref<1x2x64xbf16, #tpu.memory_space<vmem>>) attributes {dimension_semantics = [#tpu.dimension_semantics<parallel>, #tpu.dimension_semantics<parallel>], iteration_bounds = array<i64: 2, 1>, scalar_prefetch = 0 : i64, scratch_operands = 0 : i64, tpu.core_type = #tpu.core_type<tc>, window_params = [{transform_indices = @transform_0, window_bounds = array<i64: 1, 4, 64>}, {pipeline_mode = #tpu.pipeline_mode<synchronous>, transform_indices = @transform_1, window_bounds = array<i64: 2, 4>}, {pipeline_mode = #tpu.pipeline_mode<synchronous>, transform_indices = @transform_2, window_bounds = array<i64: 2, 1>}, {pipeline_mode = #tpu.pipeline_mode<synchronous>, transform_indices = @transform_3, window_bounds = array<i64: 2, 1>}, {transform_indices = @transform_4, window_bounds = array<i64: 1, 2, 64>}]} {
    %c0 = arith.constant 0 : index
    %c0_0 = arith.constant 0 : index
    %0 = vector.load %arg3[%c0, %c0_0] : memref<2x4xbf16, #tpu.memory_space<vmem>>, vector<2x4xbf16>
    %c0_1 = arith.constant 0 : index
    %c0_2 = arith.constant 0 : index
    %c0_3 = arith.constant 0 : index
    %1 = vector.load %arg2[%c0_1, %c0_2, %c0_3] : memref<1x4x64xbf16, #tpu.memory_space<vmem>>, vector<1x4x64xbf16>
    %2 = vector.shape_cast %1 : vector<1x4x64xbf16> to vector<4x64xbf16>
    %cst = arith.constant dense<0.000000e+00> : vector<2x64xf32>
    %3 = tpu.matmul %0, %2, %cst {dimension_numbers = #tpu.dot_dimension_numbers<[1], [0], [0], [1], [0, 0, 1, 1], [], []>} : vector<2x4xbf16>, vector<4x64xbf16>, vector<2x64xf32> -> vector<2x64xf32>
    %c0_4 = arith.constant 0 : index
    %c0_5 = arith.constant 0 : index
    %4 = vector.load %arg4[%c0_4, %c0_5] : memref<2x1xf32, #tpu.memory_space<vmem>>, vector<2x1xf32>
    %5 = vector.broadcast %4 : vector<2x1xf32> to vector<2x64xf32>
    %6 = arith.addf %3, %5 : vector<2x64xf32>
    %cst_6 = arith.constant 0.000000e+00 : f32
    %7 = vector.broadcast %cst_6 : f32 to vector<2x64xf32>
    %8 = arith.cmpf oge, %6, %7 : vector<2x64xf32>
    %c0_7 = arith.constant 0 : index
    %c0_8 = arith.constant 0 : index
    %9 = vector.load %arg5[%c0_7, %c0_8] : memref<2x1xf32, #tpu.memory_space<vmem>>, vector<2x1xf32>
    %10 = vector.broadcast %9 : vector<2x1xf32> to vector<2x64xf32>
    %11 = arith.mulf %10, %6 : vector<2x64xf32>
    %12 = arith.select %8, %6, %11 : vector<2x64xi1>, vector<2x64xf32>
    %13 = arith.truncf %12 : vector<2x64xf32> to vector<2x64xbf16>
    %c0_9 = arith.constant 0 : index
    %c0_10 = arith.constant 0 : index
    %c0_11 = arith.constant 0 : index
    %14 = vector.load %arg6[%c0_9, %c0_10, %c0_11] : memref<1x2x64xbf16, #tpu.memory_space<vmem>>, vector<1x2x64xbf16>
    %15 = vector.shape_cast %14 : vector<1x2x64xbf16> to vector<2x64xbf16>
    %16 = vector.shape_cast %13 : vector<2x64xbf16> to vector<1x2x64xbf16>
    tpu.vector_store %arg6[%c0_9, %c0_10, %c0_11], %16 {strides = array<i32>} : memref<1x2x64xbf16, #tpu.memory_space<vmem>>, vector<1x2x64xbf16>,
    return
  }
  func.func @transform_0(%arg0: i32, %arg1: i32) -> (i32, i32, i32) {
    %c0_i32 = arith.constant 0 : i32
    %c0_i32_0 = arith.constant 0 : i32
    return %arg0, %c0_i32, %arg1 : i32, i32, i32
  }
  func.func @transform_1(%arg0: i32, %arg1: i32) -> (i32, i32) {
    %c0_i32 = arith.constant 0 : i32
    %c0_i32_0 = arith.constant 0 : i32
    %c0_i32_1 = arith.constant 0 : i32
    return %c0_i32, %c0_i32_0 : i32, i32
  }
  func.func @transform_2(%arg0: i32, %arg1: i32) -> (i32, i32) {
    %c0_i32 = arith.constant 0 : i32
    %c0_i32_0 = arith.constant 0 : i32
    %c0_i32_1 = arith.constant 0 : i32
    return %c0_i32, %c0_i32_0 : i32, i32
  }
  func.func @transform_3(%arg0: i32, %arg1: i32) -> (i32, i32) {
    %c0_i32 = arith.constant 0 : i32
    %c0_i32_0 = arith.constant 0 : i32
    %c0_i32_1 = arith.constant 0 : i32
    return %c0_i32, %c0_i32_0 : i32, i32
  }
  func.func @transform_4(%arg0: i32, %arg1: i32) -> (i32, i32, i32) {
    %c0_i32 = arith.constant 0 : i32
    %c0_i32_0 = arith.constant 0 : i32
    return %arg0, %c0_i32, %arg1 : i32, i32, i32
  }
}

module attributes {stable_mosaic.version = 11 : i64} {
  func.func @_csa_kernel(%arg0: i32, %arg1: i32, %arg2: memref<1x18x256xbf16, #tpu.memory_space<vmem>>, %arg3: memref<1x64x18xbf16, #tpu.memory_space<vmem>>, %arg4: memref<1x144x64xbf16, #tpu.memory_space<vmem>>, %arg5: memref<1x144x256xbf16, #tpu.memory_space<vmem>>) attributes {dimension_semantics = [#tpu.dimension_semantics<parallel>, #tpu.dimension_semantics<parallel>], iteration_bounds = array<i64: 2, 1>, scalar_prefetch = 0 : i64, scratch_operands = 0 : i64, tpu.core_type = #tpu.core_type<tc>, window_params = [{transform_indices = @transform_0, window_bounds = array<i64: 1, 18, 256>}, {pipeline_mode = #tpu.pipeline_mode<synchronous>, transform_indices = @transform_1, window_bounds = array<i64: 1, 64, 18>}, {pipeline_mode = #tpu.pipeline_mode<synchronous>, transform_indices = @transform_2, window_bounds = array<i64: 1, 144, 64>}, {transform_indices = @transform_3, window_bounds = array<i64: 1, 144, 256>}]} {
    %c0 = arith.constant 0 : index
    %c0_0 = arith.constant 0 : index
    %c0_1 = arith.constant 0 : index
    %0 = vector.load %arg2[%c0, %c0_0, %c0_1] : memref<1x18x256xbf16, #tpu.memory_space<vmem>>, vector<1x18x256xbf16>
    %1 = vector.shape_cast %0 : vector<1x18x256xbf16> to vector<18x256xbf16>
    %c0_2 = arith.constant 0 : index
    %c0_3 = arith.constant 0 : index
    %c0_4 = arith.constant 0 : index
    %2 = vector.load %arg3[%c0_2, %c0_3, %c0_4] : memref<1x64x18xbf16, #tpu.memory_space<vmem>>, vector<1x64x18xbf16>
    %3 = vector.shape_cast %2 : vector<1x64x18xbf16> to vector<64x18xbf16>
    %cst = arith.constant dense<0.000000e+00> : vector<64x256xf32>
    %4 = tpu.matmul %3, %1, %cst {dimension_numbers = #tpu.dot_dimension_numbers<[1], [0], [0], [1], [0, 0, 1, 1], [], []>} : vector<64x18xbf16>, vector<18x256xbf16>, vector<64x256xf32> -> vector<64x256xf32>
    %cst_5 = arith.constant 1.000000e+01 : f32
    %5 = vector.broadcast %cst_5 : f32 to vector<64x256xf32>
    %6 = arith.mulf %4, %5 : vector<64x256xf32>
    %cst_6 = arith.constant dense<0xFF800000> : vector<256xf32>
    %7 = vector.multi_reduction <maximumf>, %6, %cst_6 [0] : vector<64x256xf32> to vector<256xf32>
    %8 = vector.shape_cast %7 : vector<256xf32> to vector<1x256xf32>
    %9 = vector.broadcast %8 : vector<1x256xf32> to vector<64x256xf32>
    %10 = arith.subf %6, %9 : vector<64x256xf32>
    %11 = math.exp %10 : vector<64x256xf32>
    %cst_7 = arith.constant dense<0.000000e+00> : vector<256xf32>
    %12 = vector.multi_reduction <add>, %11, %cst_7 [0] : vector<64x256xf32> to vector<256xf32>
    %13 = vector.shape_cast %12 : vector<256xf32> to vector<1x256xf32>
    %14 = tpu.reciprocal %13 {approx = true} : vector<1x256xf32> -> vector<1x256xf32>
    %15 = vector.broadcast %14 : vector<1x256xf32> to vector<64x256xf32>
    %16 = arith.mulf %11, %15 : vector<64x256xf32>
    %c0_8 = arith.constant 0 : index
    %c0_9 = arith.constant 0 : index
    %c0_10 = arith.constant 0 : index
    %17 = vector.load %arg4[%c0_8, %c0_9, %c0_10] : memref<1x144x64xbf16, #tpu.memory_space<vmem>>, vector<1x144x64xbf16>
    %18 = vector.shape_cast %17 : vector<1x144x64xbf16> to vector<144x64xbf16>
    %19 = arith.truncf %16 : vector<64x256xf32> to vector<64x256xbf16>
    %cst_11 = arith.constant dense<0.000000e+00> : vector<144x256xf32>
    %20 = tpu.matmul %18, %19, %cst_11 {dimension_numbers = #tpu.dot_dimension_numbers<[1], [0], [0], [1], [0, 0, 1, 1], [], []>} : vector<144x64xbf16>, vector<64x256xbf16>, vector<144x256xf32> -> vector<144x256xf32>
    %21 = arith.truncf %20 : vector<144x256xf32> to vector<144x256xbf16>
    %c0_12 = arith.constant 0 : index
    %c0_13 = arith.constant 0 : index
    %c0_14 = arith.constant 0 : index
    %22 = vector.load %arg5[%c0_12, %c0_13, %c0_14] : memref<1x144x256xbf16, #tpu.memory_space<vmem>>, vector<1x144x256xbf16>
    %23 = vector.shape_cast %22 : vector<1x144x256xbf16> to vector<144x256xbf16>
    %24 = vector.shape_cast %21 : vector<144x256xbf16> to vector<1x144x256xbf16>
    tpu.vector_store %arg5[%c0_12, %c0_13, %c0_14], %24 {strides = array<i32>} : memref<1x144x256xbf16, #tpu.memory_space<vmem>>, vector<1x144x256xbf16>,
    return
  }
  func.func @transform_0(%arg0: i32, %arg1: i32) -> (i32, i32, i32) {
    %c0_i32 = arith.constant 0 : i32
    %c0_i32_0 = arith.constant 0 : i32
    return %arg0, %c0_i32, %arg1 : i32, i32, i32
  }
  func.func @transform_1(%arg0: i32, %arg1: i32) -> (i32, i32, i32) {
    %c0_i32 = arith.constant 0 : i32
    %c0_i32_0 = arith.constant 0 : i32
    %c0_i32_1 = arith.constant 0 : i32
    return %arg0, %c0_i32, %c0_i32_0 : i32, i32, i32
  }
  func.func @transform_2(%arg0: i32, %arg1: i32) -> (i32, i32, i32) {
    %c0_i32 = arith.constant 0 : i32
    %c0_i32_0 = arith.constant 0 : i32
    %c0_i32_1 = arith.constant 0 : i32
    return %arg0, %c0_i32, %c0_i32_0 : i32, i32, i32
  }
  func.func @transform_3(%arg0: i32, %arg1: i32) -> (i32, i32, i32) {
    %c0_i32 = arith.constant 0 : i32
    %c0_i32_0 = arith.constant 0 : i32
    return %arg0, %c0_i32, %arg1 : i32, i32, i32
  }
}

module attributes {stable_mosaic.version = 11 : i64} {
  func.func @_conv1x1_prelu_kernel(%arg0: i32, %arg1: i32, %arg2: memref<1x4x256xbf16, #tpu.memory_space<vmem>>, %arg3: memref<8x4xbf16, #tpu.memory_space<vmem>>, %arg4: memref<8x1xf32, #tpu.memory_space<vmem>>, %arg5: memref<8x1xf32, #tpu.memory_space<vmem>>, %arg6: memref<1x8x256xbf16, #tpu.memory_space<vmem>>) attributes {dimension_semantics = [#tpu.dimension_semantics<parallel>, #tpu.dimension_semantics<parallel>], iteration_bounds = array<i64: 2, 1>, scalar_prefetch = 0 : i64, scratch_operands = 0 : i64, tpu.core_type = #tpu.core_type<tc>, window_params = [{transform_indices = @transform_0, window_bounds = array<i64: 1, 4, 256>}, {pipeline_mode = #tpu.pipeline_mode<synchronous>, transform_indices = @transform_1, window_bounds = array<i64: 8, 4>}, {pipeline_mode = #tpu.pipeline_mode<synchronous>, transform_indices = @transform_2, window_bounds = array<i64: 8, 1>}, {pipeline_mode = #tpu.pipeline_mode<synchronous>, transform_indices = @transform_3, window_bounds = array<i64: 8, 1>}, {transform_indices = @transform_4, window_bounds = array<i64: 1, 8, 256>}]} {
    %c0 = arith.constant 0 : index
    %c0_0 = arith.constant 0 : index
    %0 = vector.load %arg3[%c0, %c0_0] : memref<8x4xbf16, #tpu.memory_space<vmem>>, vector<8x4xbf16>
    %c0_1 = arith.constant 0 : index
    %c0_2 = arith.constant 0 : index
    %c0_3 = arith.constant 0 : index
    %1 = vector.load %arg2[%c0_1, %c0_2, %c0_3] : memref<1x4x256xbf16, #tpu.memory_space<vmem>>, vector<1x4x256xbf16>
    %2 = vector.shape_cast %1 : vector<1x4x256xbf16> to vector<4x256xbf16>
    %cst = arith.constant dense<0.000000e+00> : vector<8x256xf32>
    %3 = tpu.matmul %0, %2, %cst {dimension_numbers = #tpu.dot_dimension_numbers<[1], [0], [0], [1], [0, 0, 1, 1], [], []>} : vector<8x4xbf16>, vector<4x256xbf16>, vector<8x256xf32> -> vector<8x256xf32>
    %c0_4 = arith.constant 0 : index
    %c0_5 = arith.constant 0 : index
    %4 = vector.load %arg4[%c0_4, %c0_5] : memref<8x1xf32, #tpu.memory_space<vmem>>, vector<8x1xf32>
    %5 = vector.broadcast %4 : vector<8x1xf32> to vector<8x256xf32>
    %6 = arith.addf %3, %5 : vector<8x256xf32>
    %cst_6 = arith.constant 0.000000e+00 : f32
    %7 = vector.broadcast %cst_6 : f32 to vector<8x256xf32>
    %8 = arith.cmpf oge, %6, %7 : vector<8x256xf32>
    %c0_7 = arith.constant 0 : index
    %c0_8 = arith.constant 0 : index
    %9 = vector.load %arg5[%c0_7, %c0_8] : memref<8x1xf32, #tpu.memory_space<vmem>>, vector<8x1xf32>
    %10 = vector.broadcast %9 : vector<8x1xf32> to vector<8x256xf32>
    %11 = arith.mulf %10, %6 : vector<8x256xf32>
    %12 = arith.select %8, %6, %11 : vector<8x256xi1>, vector<8x256xf32>
    %13 = arith.truncf %12 : vector<8x256xf32> to vector<8x256xbf16>
    %c0_9 = arith.constant 0 : index
    %c0_10 = arith.constant 0 : index
    %c0_11 = arith.constant 0 : index
    %14 = vector.load %arg6[%c0_9, %c0_10, %c0_11] : memref<1x8x256xbf16, #tpu.memory_space<vmem>>, vector<1x8x256xbf16>
    %15 = vector.shape_cast %14 : vector<1x8x256xbf16> to vector<8x256xbf16>
    %16 = vector.shape_cast %13 : vector<8x256xbf16> to vector<1x8x256xbf16>
    tpu.vector_store %arg6[%c0_9, %c0_10, %c0_11], %16 {strides = array<i32>} : memref<1x8x256xbf16, #tpu.memory_space<vmem>>, vector<1x8x256xbf16>,
    return
  }
  func.func @transform_0(%arg0: i32, %arg1: i32) -> (i32, i32, i32) {
    %c0_i32 = arith.constant 0 : i32
    %c0_i32_0 = arith.constant 0 : i32
    return %arg0, %c0_i32, %arg1 : i32, i32, i32
  }
  func.func @transform_1(%arg0: i32, %arg1: i32) -> (i32, i32) {
    %c0_i32 = arith.constant 0 : i32
    %c0_i32_0 = arith.constant 0 : i32
    %c0_i32_1 = arith.constant 0 : i32
    return %c0_i32, %c0_i32_0 : i32, i32
  }
  func.func @transform_2(%arg0: i32, %arg1: i32) -> (i32, i32) {
    %c0_i32 = arith.constant 0 : i32
    %c0_i32_0 = arith.constant 0 : i32
    %c0_i32_1 = arith.constant 0 : i32
    return %c0_i32, %c0_i32_0 : i32, i32
  }
  func.func @transform_3(%arg0: i32, %arg1: i32) -> (i32, i32) {
    %c0_i32 = arith.constant 0 : i32
    %c0_i32_0 = arith.constant 0 : i32
    %c0_i32_1 = arith.constant 0 : i32
    return %c0_i32, %c0_i32_0 : i32, i32
  }
  func.func @transform_4(%arg0: i32, %arg1: i32) -> (i32, i32, i32) {
    %c0_i32 = arith.constant 0 : i32
    %c0_i32_0 = arith.constant 0 : i32
    return %arg0, %c0_i32, %arg1 : i32, i32, i32
  }
}

module attributes {stable_mosaic.version = 11 : i64} {
  func.func @_nla_kernel(%arg0: i32, %arg1: i32, %arg2: memref<1x2x256xbf16, #tpu.memory_space<vmem>>, %arg3: memref<1x2x256xbf16, #tpu.memory_space<vmem>>, %arg4: memref<1x4x256xbf16, #tpu.memory_space<vmem>>, %arg5: memref<1x4x256xbf16, #tpu.memory_space<vmem>>) attributes {dimension_semantics = [#tpu.dimension_semantics<parallel>, #tpu.dimension_semantics<parallel>], iteration_bounds = array<i64: 2, 1>, scalar_prefetch = 0 : i64, scratch_operands = 0 : i64, tpu.core_type = #tpu.core_type<tc>, window_params = [{transform_indices = @transform_0, window_bounds = array<i64: 1, 2, 256>}, {pipeline_mode = #tpu.pipeline_mode<synchronous>, transform_indices = @transform_1, window_bounds = array<i64: 1, 2, 256>}, {pipeline_mode = #tpu.pipeline_mode<synchronous>, transform_indices = @transform_2, window_bounds = array<i64: 1, 4, 256>}, {transform_indices = @transform_3, window_bounds = array<i64: 1, 4, 256>}]} {
    %c0 = arith.constant 0 : index
    %c0_0 = arith.constant 0 : index
    %c0_1 = arith.constant 0 : index
    %0 = vector.load %arg2[%c0, %c0_0, %c0_1] : memref<1x2x256xbf16, #tpu.memory_space<vmem>>, vector<1x2x256xbf16>
    %1 = vector.shape_cast %0 : vector<1x2x256xbf16> to vector<2x256xbf16>
    %c0_2 = arith.constant 0 : index
    %c0_3 = arith.constant 0 : index
    %c0_4 = arith.constant 0 : index
    %2 = vector.load %arg3[%c0_2, %c0_3, %c0_4] : memref<1x2x256xbf16, #tpu.memory_space<vmem>>, vector<1x2x256xbf16>
    %3 = vector.shape_cast %2 : vector<1x2x256xbf16> to vector<2x256xbf16>
    %c0_5 = arith.constant 0 : index
    %c0_6 = arith.constant 0 : index
    %c0_7 = arith.constant 0 : index
    %4 = vector.load %arg4[%c0_5, %c0_6, %c0_7] : memref<1x4x256xbf16, #tpu.memory_space<vmem>>, vector<1x4x256xbf16>
    %5 = vector.shape_cast %4 : vector<1x4x256xbf16> to vector<4x256xbf16>
    %cst = arith.constant dense<0.000000e+00> : vector<256x256xf32>
    %6 = tpu.matmul %3, %1, %cst {dimension_numbers = #tpu.dot_dimension_numbers<[0], [0], [1], [1], [0, 1, 1, 1], [], []>} : vector<2x256xbf16>, vector<2x256xbf16>, vector<256x256xf32> -> vector<256x256xf32>
    %cst_8 = arith.constant dense<0xFF800000> : vector<256xf32>
    %7 = vector.multi_reduction <maximumf>, %6, %cst_8 [0] : vector<256x256xf32> to vector<256xf32>
    %8 = vector.shape_cast %7 : vector<256xf32> to vector<1x256xf32>
    %9 = vector.broadcast %8 : vector<1x256xf32> to vector<256x256xf32>
    %10 = arith.subf %6, %9 : vector<256x256xf32>
    %11 = math.exp %10 : vector<256x256xf32>
    %cst_9 = arith.constant dense<0.000000e+00> : vector<256xf32>
    %12 = vector.multi_reduction <add>, %11, %cst_9 [0] : vector<256x256xf32> to vector<256xf32>
    %13 = vector.shape_cast %12 : vector<256xf32> to vector<1x256xf32>
    %14 = tpu.reciprocal %13 {approx = true} : vector<1x256xf32> -> vector<1x256xf32>
    %15 = vector.broadcast %14 : vector<1x256xf32> to vector<256x256xf32>
    %16 = arith.mulf %11, %15 : vector<256x256xf32>
    %17 = arith.truncf %16 : vector<256x256xf32> to vector<256x256xbf16>
    %cst_10 = arith.constant dense<0.000000e+00> : vector<4x256xf32>
    %18 = tpu.matmul %5, %17, %cst_10 {dimension_numbers = #tpu.dot_dimension_numbers<[1], [0], [0], [1], [0, 0, 1, 1], [], []>} : vector<4x256xbf16>, vector<256x256xbf16>, vector<4x256xf32> -> vector<4x256xf32>
    %19 = arith.truncf %18 : vector<4x256xf32> to vector<4x256xbf16>
    %c0_11 = arith.constant 0 : index
    %c0_12 = arith.constant 0 : index
    %c0_13 = arith.constant 0 : index
    %20 = vector.load %arg5[%c0_11, %c0_12, %c0_13] : memref<1x4x256xbf16, #tpu.memory_space<vmem>>, vector<1x4x256xbf16>
    %21 = vector.shape_cast %20 : vector<1x4x256xbf16> to vector<4x256xbf16>
    %22 = vector.shape_cast %19 : vector<4x256xbf16> to vector<1x4x256xbf16>
    tpu.vector_store %arg5[%c0_11, %c0_12, %c0_13], %22 {strides = array<i32>} : memref<1x4x256xbf16, #tpu.memory_space<vmem>>, vector<1x4x256xbf16>,
    return
  }
  func.func @transform_0(%arg0: i32, %arg1: i32) -> (i32, i32, i32) {
    %c0_i32 = arith.constant 0 : i32
    %c0_i32_0 = arith.constant 0 : i32
    return %arg0, %c0_i32, %arg1 : i32, i32, i32
  }
  func.func @transform_1(%arg0: i32, %arg1: i32) -> (i32, i32, i32) {
    %c0_i32 = arith.constant 0 : i32
    %c0_i32_0 = arith.constant 0 : i32
    %c0_i32_1 = arith.constant 0 : i32
    return %arg0, %c0_i32, %c0_i32_0 : i32, i32, i32
  }
  func.func @transform_2(%arg0: i32, %arg1: i32) -> (i32, i32, i32) {
    %c0_i32 = arith.constant 0 : i32
    %c0_i32_0 = arith.constant 0 : i32
    %c0_i32_1 = arith.constant 0 : i32
    return %arg0, %c0_i32, %c0_i32_0 : i32, i32, i32
  }
  func.func @transform_3(%arg0: i32, %arg1: i32) -> (i32, i32, i32) {
    %c0_i32 = arith.constant 0 : i32
    %c0_i32_0 = arith.constant 0 : i32
    return %arg0, %c0_i32, %arg1 : i32, i32, i32
  }
}

</mosaic_0001>

<bundles_post_ra>
// kernel: recurrent_projection.7
= control target key start
LH: loop header
LB: loop body
LE: loop exit
PB: predicated region body
PF: predicated region fallthrough
CT: control target
= control target key end

     0   :  { %s509_s15 = smov 0   ;;  %s511_s16 = smov 0   ;;  %s555_s0 = inlined_call_operand.vmem [shape: bf16[2,4,256], index: 0, kind: input, shape index: {}]   ;;  %s556_s1 = inlined_call_operand.vmem [shape: bf16[6,4], index: 1, kind: input, shape index: {}]   ;;  %s557_s2 = inlined_call_operand.vmem [shape: f32[6,1], index: 2, kind: input, shape index: {}]   ;;  %s558_s3 = inlined_call_operand.vmem [shape: f32[6,1], index: 3, kind: input, shape index: {}]   ;;  %s559_s4 = inlined_call_operand.vmem [shape: bf16[2,6,256], index: 4, kind: output, shape index: {}]  }
   0x1   :  { %s513_s17 = smov 0  }
   0x2 LB: > { %s26_s18 = sadd.s32 1, %s477_s16  ;;  %p419_p0 = scmp.ge.s32.totalorder %s481_s17, 1  ;;  %s481_s17 = sphi %s513_s17, %s14_s17   ;;  %s477_s16 = sphi %s511_s16, %s561_s16   ;;  %s473_s15 = sphi %s509_s15, %s560_s15  }
   0x3   : > { %p28_p1 = scmp.ge.s32.totalorder %s26_s18, 2  ;;  %p183_p2 = scmp.lt.s32.totalorder %s481_s17, 3 }
   0x5   : > { %s563_s18 = smov (%p28_p1, %s26_s18), 0  ;;  %p184_p3 = pnand %p419_p0, %p183_p2 }
   0x6   : > { %p218_p4 = scmp.lt.s32.totalorder (!%p184_p3), %s473_s15, 1  ;;  %v483_v0 = vmov (!%p184_p3), 0   ;;  %v240_v1 = vld [vmem:[%s557_s2] sm:$0x3f] (!%p184_p3)  ;;  %vm259_vm0 = vcmask (!%p184_p3), 1041408   ;;  %vm255_vm1 = vcmask (!%p184_p3), 31744  }
   0x7   : > { %187 = sbr.rel (%p184_p3) target bundleno = 245 (0xf5), region = 36  ;;  %298 = vmatprep.mubr.bf16.mxu0 (!%p184_p3), %v483_v0  ;;  %458 = vset.pattern.permute.xlu0 (!%p184_p3), %v483_v0  ;;  %v309_v2 = vld [vmem:[%s558_s3] sm:$0x3f] (!%p184_p3) }
   0x8   : > { %243 = vperm.xlu0 (!%p184_p3), %458, %v240_v1   ;;  %v238_v6 = vld [vmem:[%s556_s1] sm:$0x7] (!%p184_p3) }
   0xc   : > { %312 = vperm.xlu0 (!%p184_p3), %458, %v309_v2  }
   0xe   : > { %s565_s15 = smov (!%p218_p4, %s473_s15), 1 }
   0xf   : > { %s430_s23 = sshll.u32 %s565_s15, 2  ;;  %s431_s29 = sshll.u32 %s565_s15, 3 }
  0x10   : > { %s225_s26 = scalar_lea.vmem %s555_s0, %s430_s23  ;;  %s235_s6 = scalar_lea.vmem %s559_s4, %s431_s29 }
  0x11   : > { %v424_v3 = vld.sshfl [vmem:[%s225_s26] sm:$0x33 pattern:$0x76325410] }
  0x12   : > { %v254_v4 = vcombine.high %v424_v3, %v424_v3  ;;  %v261_v5 = vsel %vm259_vm0, %v424_v3, 0 }
  0x14   : > { %425 = vmatprep.subr.msk.bf16.mxu0 %vm259_vm0, %v254_v4 }
  0x15   : > { %267 = vmatpush1.bf16.msra.mxu0 %v261_v5 }
  0x18   : > { %426 = vmatmul.mubr.msk.bf16.vlgmr.msra.gmra.mrb[0].mxu0 %vm255_vm1, %v238_v6 }
  0x87   : > { %v244_v7 = vpop.permute.xlu0 %243 }
  0x8b   : > { %v313_v11 = vpop.permute.xlu0 %312 }
  0xeb   : > { %v300_v8 = vpop.f32.mrb[0].mxu0 }
  0xec   : > { %v301_v9 = vadd.f32 %v300_v8, %v244_v7  ;;  %v302_v10 = vpop.f32.mrb[1].mxu0 }
  0xed   : > { %v303_v12 = vadd.f32 %v302_v10, %v244_v7  ;;  %v304_v13 = vpop.f32.mrb[2].mxu0 }
  0xee   : > { %vm307_vm2 = vcmp.ge.f32.partialorder %v301_v9, 0.0  ;;  %v315_v14 = vmul.f32 %v313_v11, %v301_v9  ;;  %v305_v15 = vpop.f32.mrb[3].mxu0 }
  0xef   : > { %vm308_vm3 = vcmp.ge.f32.partialorder %v303_v12, 0.0  ;;  %v316_v16 = vmul.f32 %v313_v11, %v303_v12 }
  0xf0   : > { %v317_v17 = vsel %vm307_vm2, %v301_v9, %v315_v14 }
  0xf1   : > { %v318_v18 = vsel %vm308_vm3, %v303_v12, %v316_v16 }
  0xf2   : > { %v432_v19 = vpack.c.bf16 %v318_v18, %v317_v17 }
  0xf4   : > { %327 = vst [vmem:[%s235_s6] sm:$0x77] %v432_v19 }
  0xf5 PF: > { %s14_s17 = sadd.s32 1, %s481_s17   ;;  %s560_s15 = smov %s477_s16 }
  0xf6   : > { %p11_p5 = scmp.ge.s32.totalorder %s14_s17, 4   ;;  %s561_s16 = smov %s563_s18 }
  0xf8   :  { %13 = sbr.rel (!%p11_p5) target bundleno = 2 (0x2), region = 66 }

// kernel: recurrent_projection.8
= control target key start
LH: loop header
LB: loop body
LE: loop exit
PB: predicated region body
PF: predicated region fallthrough
CT: control target
= control target key end

     0   :  { %s456_s15 = smov 0   ;;  %s458_s16 = smov 0   ;;  %s498_s0 = inlined_call_operand.vmem [shape: bf16[2,4,64], index: 0, kind: input, shape index: {}]   ;;  %s499_s1 = inlined_call_operand.vmem [shape: bf16[2,4], index: 1, kind: input, shape index: {}]   ;;  %s500_s2 = inlined_call_operand.vmem [shape: f32[2,1], index: 2, kind: input, shape index: {}]   ;;  %s501_s3 = inlined_call_operand.vmem [shape: f32[2,1], index: 3, kind: input, shape index: {}]   ;;  %s502_s4 = inlined_call_operand.vmem [shape: bf16[2,2,64], index: 4, kind: output, shape index: {}]  }
   0x1   :  { %s460_s17 = smov 0  }
   0x2 LB: > { %s26_s18 = sadd.s32 1, %s422_s16  ;;  %p363_p0 = scmp.ge.s32.totalorder %s426_s17, 1  ;;  %s426_s17 = sphi %s460_s17, %s14_s17   ;;  %s422_s16 = sphi %s458_s16, %s504_s16   ;;  %s418_s15 = sphi %s456_s15, %s503_s15  }
   0x3   : > { %p28_p1 = scmp.ge.s32.totalorder %s26_s18, 2  ;;  %p180_p2 = scmp.lt.s32.totalorder %s426_s17, 3 }
   0x5   : > { %s506_s18 = smov (%p28_p1, %s26_s18), 0  ;;  %p181_p3 = pnand %p363_p0, %p180_p2 }
   0x6   : > { %p209_p4 = scmp.lt.s32.totalorder (!%p181_p3), %s418_s15, 1  ;;  %v428_v0 = vmov (!%p181_p3), 0.0   ;;  %vm429_vm0 = vmmov (!%p181_p3), 0   ;;  %v225_v1 = vld [vmem:[%s500_s2] sm:$0x3] (!%p181_p3)  ;;  %v430_v2 = vmov (!%p181_p3), 0  }
   0x7   : > { %184 = sbr.rel (%p181_p3) target bundleno = 242 (0xf2), region = 36  ;;  %370 = vmatprep.subr.bf16.mxu0 (!%p181_p3), %v428_v0  ;;  %372 = vmatprep.mubr.msk.bf16.mxu0 (!%p181_p3), %vm429_vm0, %v428_v0  ;;  %vm235_vm1 = vcmask (!%p181_p3), 1041408   ;;  %v280_v3 = vld [vmem:[%s501_s3] sm:$0x3] (!%p181_p3)  ;;  %vm231_vm2 = vcmask (!%p181_p3), 31744   ;;  %vm289_vm4 = vcmask (!%p181_p3), 516096  }
   0x8   : > { %403 = vset.pattern.permute.xlu0 (!%p181_p3), %v430_v2  ;;  %v223_v6 = vld [vmem:[%s499_s1] sm:$0x1] (!%p181_p3) }
   0x9   : > { %228 = vperm.xlu0 (!%p181_p3), %403, %v225_v1  }
   0xd   : > { %283 = vperm.xlu0 (!%p181_p3), %403, %v280_v3  }
   0xe   : > { %s508_s15 = smov (!%p209_p4, %s418_s15), 1 }
   0xf   : > { %s364_s21 = sshll.u32 %s508_s15, 1  ;;  %s221_s5 = scalar_lea.vmem %s502_s4, %s508_s15 }
  0x10   : > { %s215_s26 = scalar_lea.vmem %s498_s0, %s364_s21 }
  0x11   : > { %v224_v4 = vld [vmem:[%s215_s26] sm:$0x3] }
  0x12   : > { %v237_v5 = vsel %vm235_vm1, %v224_v4, 0 }
  0x13   : > { %371 = vmatpush3.bf16.msra.mxu0 %v237_v5 }
  0x16   : > { %373 = vmatmul.mubr.msk.bf16.vlgmr.msra.gmra.mrb[0].mxu0 %vm231_vm2, %v223_v6 }
  0x88   : > { %v229_v7 = vpop.permute.xlu0 %228 }
  0x8c   : > { %v284_v11 = vpop.permute.xlu0 %283 }
  0xe9   : > { %v273_v8 = vpop.f32.mrb[0].mxu0 }
  0xea   : > { %v274_v9 = vadd.f32 %v273_v8, %v229_v7  ;;  %v374_v10 = vpop.f32.mrb[1].mxu0 }
  0xeb   : > { %v276_v12 = vpop.f32.mrb[2].mxu0 }
  0xec   : > { %vm279_vm3 = vcmp.ge.f32.partialorder %v274_v9, 0.0  ;;  %v286_v13 = vmul.f32 %v284_v11, %v274_v9  ;;  %v375_v14 = vpop.f32.mrb[3].mxu0 }
  0xee   : > { %v287_v15 = vsel %vm279_vm3, %v274_v9, %v286_v13 }
  0xef   : > { %v288_v16 = vpack.c.bf16 %v287_v15, %v287_v15 }
  0xf1   : > { %290 = vst.msk [vmem:[%s221_s5] sm:$0x1] %vm289_vm4, %v288_v16 }
  0xf2 PF: > { %s14_s17 = sadd.s32 1, %s426_s17   ;;  %s503_s15 = smov %s422_s16 }
  0xf3   : > { %p11_p5 = scmp.ge.s32.totalorder %s14_s17, 4   ;;  %s504_s16 = smov %s506_s18 }
  0xf5   :  { %13 = sbr.rel (!%p11_p5) target bundleno = 2 (0x2), region = 66 }

// kernel: recurrent_projection.9
= control target key start
LH: loop header
LB: loop body
LE: loop exit
PB: predicated region body
PF: predicated region fallthrough
CT: control target
= control target key end

     0   :  { %s1204_s12 = smov 0   ;;  %s1206_s13 = smov 0   ;;  %s1338_s0 = inlined_call_operand.vmem [shape: bf16[2,18,256], index: 0, kind: input, shape index: {}]   ;;  %s1339_s1 = inlined_call_operand.vmem [shape: bf16[2,64,18], index: 1, kind: input, shape index: {}]   ;;  %s1340_s2 = inlined_call_operand.vmem [shape: bf16[2,144,64], index: 2, kind: input, shape index: {}]   ;;  %s1341_s3 = inlined_call_operand.vmem [shape: bf16[2,144,256], index: 3, kind: output, shape index: {}]  }
   0x1   :  { %s1208_s14 = smov 0  }
   0x2 LB: > { %s25_s15 = sadd.s32 1, %s1177_s13  ;;  %p993_p0 = scmp.ge.s32.totalorder %s1181_s14, 1  ;;  %s1181_s14 = sphi %s1208_s14, %s13_s14   ;;  %s1177_s13 = sphi %s1206_s13, %s1343_s13   ;;  %s1173_s12 = sphi %s1204_s12, %s1342_s12  }
   0x3   : > { %p27_p1 = scmp.ge.s32.totalorder %s25_s15, 2  ;;  %p178_p2 = scmp.lt.s32.totalorder %s1181_s14, 3 }
   0x5   : > { %s1345_s15 = smov (%p27_p1, %s25_s15), 0  ;;  %p179_p3 = pnand %p993_p0, %p178_p2 }
   0x6   : > { %p221_p4 = scmp.lt.s32.totalorder (!%p179_p3), %s1173_s12, 1  ;;  %v1183_v0 = vmov (!%p179_p3), 0   ;;  %vm310_vm0 = vcmask (!%p179_p3), 1040384   ;;  %vm297_vm1 = vcmask (!%p179_p3), 146432   ;;  %vm595_vm2 = vcmask (!%p179_p3), 523264  }
   0x7   : > { %182 = sbr.rel (%p179_p3) target bundleno = 620 (0x26c), region = 32  ;;  %349 = vmatprep.mubr.bf16.mxu0 (!%p179_p3), %v1183_v0  ;;  %685 = vmatprep.mubr.bf16.mxu1 (!%p179_p3), %v1183_v0 }
   0xe   : > { %s1347_s12 = smov (!%p221_p4, %s1173_s12), 1 }
   0xf   : > { %s1077_s16 = smul.u32 24, %s1347_s12  ;;  %s1050_s17 = sshll.u32 %s1347_s12, 5 }
  0x10   : > { %s234_s20 = scalar_lea.vmem %s1339_s1, %s1050_s17  ;;  %s1078_s24 = smul.u32 72, %s1347_s12 }
  0x11   : > { %s228_s23 = scalar_lea.vmem %s1338_s0, %s1077_s16  ;;  %v1110_v7 = vld [vmem:[%s234_s20] sm:$0xff]   ;;  %v1111_v8 = vld [vmem:[%s234_s20 + $0x8] sm:$0xff]   ;;  %v1112_v9 = vld [vmem:[%s234_s20 + $0x10] sm:$0xff]   ;;  %s1079_s28 = smul.u32 144, %s1347_s12 }
  0x12   : > { %v253_v1 = vld [vmem:[%s228_s23 + $0x10] sm:$0x11]  ;;  %v1105_v2 = vld [vmem:[%s228_s23 + $0x4] ss:$8 sps:$4 sm:$0xff]   ;;  %v1108_v4 = vld [vmem:[%s228_s23] ss:$8 sps:$4 sm:$0xff]   ;;  %s1238_s27 = scalar_lea.vmem %s1340_s2, %s1078_s24 }
  0x13   : > { %v1006_v3 = vcombine.high %v253_v1, %v253_v1  ;;  %v1005_v5 = vcombine.low %v253_v1, %v253_v1  ;;  %317 = vmatprep.subr.bf16.mxu0 %v1105_v2  ;;  %v1113_v10 = vld [vmem:[%s234_s20 + $0x18] sm:$0xff]   ;;  %s1309_s4 = scalar_lea.vmem %s1341_s3, %s1079_s28 }
  0x14   : > { %318 = vmatpush1.bf16.msra.mxu0 %v1108_v4 }
  0x15   : > { %v312_v6 = vsel %vm310_vm0, %v1005_v5, 0  ;;  %1007 = vmatprep.subr.msk.bf16.mxu0 %vm310_vm0, %v1006_v3 }
  0x18   : > { %320 = vmatpush1.bf16.msra.mxu0 %v312_v6 }
  0x1b   : > { %1008 = vmatmul.mubr.msk.bf16.vlgmr.msra.gmra.mrb[0].mxu0 %vm297_vm1, %v1110_v7 }
  0x1c   : > { %359 = vmatprep.mubr.bf16.mxu0 %v1183_v0 }
  0x23   : > { %1009 = vmatmul.mubr.msk.bf16.gmra.mrb[4].mxu0 %vm297_vm1, %v1111_v8 }
  0x24   : > { %369 = vmatprep.mubr.bf16.mxu0 %v1183_v0 }
  0x2b   : > { %1010 = vmatmul.mubr.msk.bf16.gmra.mrb[8].mxu0 %vm297_vm1, %v1112_v9 }
  0x2c   : > { %379 = vmatprep.mubr.bf16.mxu0 %v1183_v0 }
  0x33   : > { %1011 = vmatmul.mubr.msk.bf16.gmra.mrb[12].mxu0 %vm297_vm1, %v1113_v10 }
  0x34   : > { %655 = vmatprep.mubr.bf16.mxu0 %v1183_v0 }
  0xee   : > { %v351_v11 = vpop.f32.mrb[0].mxu0 }
  0xef   : > { %v353_v12 = vpop.f32.mrb[1].mxu0  ;;  %v390_v16 = vmul.f32 10.0, %v351_v11 }
  0xf0   : > { %v355_v13 = vpop.f32.mrb[2].mxu0  ;;  %v1246_v19 = vmul.f32 10.0, %v353_v12 }
  0xf1   : > { %v357_v14 = vpop.f32.mrb[3].mxu0  ;;  %v392_v22 = vmul.f32 10.0, %v355_v13 }
  0xf2   : > { %v1251_v26 = vmul.f32 10.0, %v357_v14 }
  0xf6   : > { %v361_v15 = vpop.f32.mrb[4].mxu0 }
  0xf7   : > { %v1244_v17 = vmul.f32 10.0, %v361_v15  ;;  %v363_v18 = vpop.f32.mrb[5].mxu0 }
  0xf8   : > { %v1248_v20 = vmul.f32 10.0, %v363_v18  ;;  %v365_v21 = vpop.f32.mrb[6].mxu0 }
  0xf9   : > { %v406_v23 = vmax.f32 %v390_v16, %v1244_v17  ;;  %v396_v24 = vmul.f32 10.0, %v365_v21  ;;  %v367_v25 = vpop.f32.mrb[7].mxu0 }
  0xfa   : > { %v419_v27 = vmax.f32 %v1246_v19, %v1248_v20  ;;  %v1255_v28 = vmul.f32 10.0, %v367_v25 }
  0xfb   : > { %v407_v29 = vmax.f32 %v392_v22, %v396_v24 }
  0xfc   : > { %v420_v30 = vmax.f32 %v1251_v26, %v1255_v28 }
  0xfe   : > { %v371_v31 = vpop.f32.mrb[8].mxu0 }
  0xff   : > { %v398_v32 = vmul.f32 10.0, %v371_v31  ;;  %v373_v33 = vpop.f32.mrb[9].mxu0 }
 0x100   : > { %v1259_v34 = vmul.f32 10.0, %v373_v33  ;;  %v375_v35 = vpop.f32.mrb[10].mxu0 }
 0x101   : > { %v408_v36 = vmax.f32 %v406_v23, %v398_v32  ;;  %v400_v37 = vmul.f32 10.0, %v375_v35  ;;  %v377_v38 = vpop.f32.mrb[11].mxu0 }
 0x102   : > { %v421_v39 = vmax.f32 %v419_v27, %v1259_v34  ;;  %v1262_v40 = vmul.f32 10.0, %v377_v38 }
 0x103   : > { %v409_v41 = vmax.f32 %v407_v29, %v400_v37 }
 0x104   : > { %v422_v42 = vmax.f32 %v420_v30, %v1262_v40 }
 0x106   : > { %v381_v43 = vpop.f32.mrb[12].mxu0 }
 0x107   : > { %v402_v44 = vmul.f32 10.0, %v381_v43  ;;  %v383_v45 = vpop.f32.mrb[13].mxu0 }
 0x108   : > { %v1265_v46 = vmul.f32 10.0, %v383_v45  ;;  %v385_v47 = vpop.f32.mrb[14].mxu0 }
 0x109   : > { %v410_v48 = vmax.f32 %v408_v36, %v402_v44  ;;  %v404_v49 = vmul.f32 10.0, %v385_v47  ;;  %v387_v50 = vpop.f32.mrb[15].mxu0 }
 0x10a   : > { %v423_v51 = vmax.f32 %v421_v39, %v1265_v46  ;;  %v1268_v52 = vmul.f32 10.0, %v387_v50 }
 0x10b   : > { %v411_v53 = vmax.f32 %v409_v41, %v404_v49 }
 0x10c   : > { %v424_v54 = vmax.f32 %v422_v42, %v1268_v52 }
 0x10d   : > { %v412_v55 = vmax.f32 %v410_v48, %v411_v53 }
 0x10e   : > { %v425_v56 = vmax.f32 %v423_v51, %v424_v54 }
 0x10f   : > { %v413_v57 = vrot.slane %v412_v55, 4 }
 0x110   : > { %v426_v58 = vrot.slane %v425_v56, 4 }
 0x111   : > { %v414_v59 = vmax.f32 %v412_v55, %v413_v57 }
 0x112   : > { %v427_v60 = vmax.f32 %v425_v56, %v426_v58 }
 0x113   : > { %v415_v61 = vrot.slane %v414_v59, 2 }
 0x114   : > { %v428_v62 = vrot.slane %v427_v60, 2 }
 0x115   : > { %v416_v63 = vmax.f32 %v414_v59, %v415_v61 }
 0x116   : > { %v429_v1 = vmax.f32 %v427_v60, %v428_v62 }
 0x117   : > { %v417_v2 = vrot.slane %v416_v63, 1 }
 0x118   : > { %v430_v3 = vrot.slane %v429_v1, 1 }
 0x119   : > { %v418_v4 = vmax.f32 %v416_v63, %v417_v2 }
 0x11a   : > { %v431_v5 = vmax.f32 %v429_v1, %v430_v3 }
 0x11b   : > { %v432_v6 = vsub.f32 %v390_v16, %v418_v4  ;;  %v434_v7 = vsub.f32 %v392_v22, %v418_v4  ;;  %v436_v8 = vsub.f32 %v1244_v17, %v418_v4  ;;  %v438_v9 = vsub.f32 %v396_v24, %v418_v4 }
 0x11c   : > { %v440_v10 = vsub.f32 %v398_v32, %v418_v4  ;;  %v442_v11 = vsub.f32 %v400_v37, %v418_v4  ;;  %v444_v12 = vsub.f32 %v402_v44, %v418_v4  ;;  %v446_v13 = vsub.f32 %v404_v49, %v418_v4 }
 0x11d   : > { %v448_v14 = vmul.f32 1.442695, %v432_v6  ;;  %v452_v15 = vmul.f32 1.442695, %v434_v7  ;;  %v433_v18 = vsub.f32 %v1246_v19, %v431_v5  ;;  %v456_v21 = vmul.f32 1.442695, %v436_v8 }
 0x11e   : > { %v435_v23 = vsub.f32 %v1251_v26, %v431_v5  ;;  %v460_v25 = vmul.f32 1.442695, %v438_v9  ;;  %v437_v27 = vsub.f32 %v1248_v20, %v431_v5  ;;  %v439_v16 = vsub.f32 %v1255_v28, %v431_v5 }
 0x11f   : > { %1123 = vpow2.f32 %v448_v14  ;;  %v441_v17 = vsub.f32 %v1259_v34, %v431_v5  ;;  %v443_v22 = vsub.f32 %v1262_v40, %v431_v5  ;;  %v464_v24 = vmul.f32 1.442695, %v440_v10 }
 0x120   : > { %1125 = vpow2.f32 %v452_v15  ;;  %v445_v29 = vsub.f32 %v1265_v46, %v431_v5  ;;  %v447_v30 = vsub.f32 %v1268_v52, %v431_v5  ;;  %v468_v19 = vmul.f32 1.442695, %v442_v11 }
 0x121   : > { %1127 = vpow2.f32 %v456_v21  ;;  %v450_v31 = vmul.f32 1.442695, %v433_v18  ;;  %v454_v26 = vmul.f32 1.442695, %v435_v23  ;;  %v472_v32 = vmul.f32 1.442695, %v444_v12 }
 0x122   : > { %1129 = vpow2.f32 %v460_v25  ;;  %v458_v20 = vmul.f32 1.442695, %v437_v27  ;;  %v476_v33 = vmul.f32 1.442695, %v446_v13  ;;  %v462_v28 = vmul.f32 1.442695, %v439_v16 }
 0x123   : > { %1131 = vpow2.f32 %v464_v24  ;;  %v466_v36 = vmul.f32 1.442695, %v441_v17  ;;  %v470_v39 = vmul.f32 1.442695, %v443_v22  ;;  %v474_v42 = vmul.f32 1.442695, %v445_v29 }
 0x124   : > { %1133 = vpow2.f32 %v468_v19  ;;  %v478_v46 = vmul.f32 1.442695, %v447_v30 }
 0x125   : > { %1135 = vpow2.f32 %v450_v31 }
 0x126   : > { %1137 = vpow2.f32 %v454_v26 }
 0x127   : > { %1139 = vpow2.f32 %v472_v32 }
 0x128   : > { %1141 = vpow2.f32 %v458_v20 }
 0x129   : > { %v1124_v34 = vpop.eup %1123  ;;  %1143 = vpow2.f32 %v476_v33 }
 0x12a   : > { %v1126_v35 = vpop.eup %1125  ;;  %1145 = vpow2.f32 %v462_v28 }
 0x12b   : > { %v480_v37 = vadd.f32 %v1126_v35, %v1124_v34  ;;  %v1128_v38 = vpop.eup %1127  ;;  %1147 = vpow2.f32 %v466_v36 }
 0x12c   : > { %v1130_v41 = vpop.eup %1129  ;;  %1149 = vpow2.f32 %v470_v39 }
 0x12d   : > { %v481_v40 = vadd.f32 %v1128_v38, %v480_v37  ;;  %v1132_v43 = vpop.eup %1131  ;;  %1151 = vpow2.f32 %v474_v42 }
 0x12e   : > { %v1134_v45 = vpop.eup %1133  ;;  %1153 = vpow2.f32 %v478_v46  ;;  %v1119_v46 = vld [vmem:[%s1238_s27 + $0x8] sm:$0xff]  }
 0x12f   : > { %v482_v44 = vadd.f32 %v1130_v41, %v481_v40  ;;  %v1136_v47 = vpop.eup %1135 }
 0x130   : > { %v1138_v49 = vpop.eup %1137 }
 0x131   : > { %v483_v48 = vadd.f32 %v1132_v43, %v482_v44  ;;  %v1140_v50 = vpop.eup %1139  ;;  %v493_v52 = vadd.f32 %v1138_v49, %v1136_v47  ;;  %v1117_v44 = vld [vmem:[%s1238_s27] sm:$0xff]  }
 0x132   : > { %v1142_v53 = vpop.eup %1141 }
 0x133   : > { %v484_v51 = vadd.f32 %v1134_v45, %v483_v48  ;;  %v1144_v54 = vpop.eup %1143  ;;  %v494_v56 = vadd.f32 %v1142_v53, %v493_v52  ;;  %v1121_v48 = vld [vmem:[%s1238_s27 + $0x10] sm:$0xff]  }
 0x134   : > { %v1146_v57 = vpop.eup %1145 }
 0x135   : > { %v485_v55 = vadd.f32 %v1140_v50, %v484_v51  ;;  %v495_v59 = vadd.f32 %v1146_v57, %v494_v56  ;;  %v1148_v60 = vpop.eup %1147  ;;  %v1122_v51 = vld [vmem:[%s1238_s27 + $0x40] sm:$0xff]  }
 0x136   : > { %v1150_v63 = vpop.eup %1149 }
 0x137   : > { %v486_v58 = vadd.f32 %v1144_v54, %v485_v55  ;;  %v496_v62 = vadd.f32 %v1148_v60, %v495_v59  ;;  %v1152_v3 = vpop.eup %1151 }
 0x138   : > { %v1154_v6 = vpop.eup %1153 }
 0x139   : > { %v487_v61 = vrot.slane %v486_v58, 4  ;;  %v497_v2 = vadd.f32 %v1150_v63, %v496_v62 }
 0x13b   : > { %v488_v1 = vadd.f32 %v487_v61, %v486_v58  ;;  %v498_v5 = vadd.f32 %v1152_v3, %v497_v2 }
 0x13d   : > { %v489_v4 = vrot.slane %v488_v1, 2  ;;  %v499_v8 = vadd.f32 %v1154_v6, %v498_v5 }
 0x13f   : > { %v490_v7 = vadd.f32 %v489_v4, %v488_v1  ;;  %v500_v10 = vrot.slane %v499_v8, 4 }
 0x141   : > { %v491_v9 = vrot.slane %v490_v7, 1  ;;  %v501_v12 = vadd.f32 %v500_v10, %v499_v8 }
 0x143   : > { %v492_v11 = vadd.f32 %v491_v9, %v490_v7  ;;  %v502_v13 = vrot.slane %v501_v12, 2 }
 0x145   : > { %1155 = vrcp.f32 %v492_v11  ;;  %v503_v14 = vadd.f32 %v502_v13, %v501_v12 }
 0x147   : > { %v504_v15 = vrot.slane %v503_v14, 1 }
 0x149   : > { %v505_v18 = vadd.f32 %v504_v15, %v503_v14 }
 0x14b   : > { %1157 = vrcp.f32 %v505_v18 }
 0x14f   : > { %v1156_v21 = vpop.eup %1155 }
 0x150   : > { %v508_v23 = vmul.f32 %v1156_v21, %v1124_v34  ;;  %v510_v25 = vmul.f32 %v1156_v21, %v1126_v35  ;;  %v512_v27 = vmul.f32 %v1156_v21, %v1128_v38  ;;  %v514_v16 = vmul.f32 %v1156_v21, %v1130_v41 }
 0x151   : > { %v516_v17 = vmul.f32 %v1156_v21, %v1132_v43  ;;  %v518_v22 = vmul.f32 %v1156_v21, %v1134_v45  ;;  %v520_v24 = vmul.f32 %v1156_v21, %v1140_v50  ;;  %v522_v29 = vmul.f32 %v1156_v21, %v1144_v54  ;;  %v1114_v43 = vld [vmem:[%s1238_s27 + $0x18] sm:$0xff]   ;;  %v1115_v45 = vld [vmem:[%s1238_s27 + $0x20] sm:$0xff]  }
 0x152   : > { %v542_v30 = vpack.c.bf16 %v510_v25, %v508_v23  ;;  %v544_v19 = vpack.c.bf16 %v514_v16, %v512_v27  ;;  %v1120_v50 = vld [vmem:[%s1238_s27 + $0x38] sm:$0xff]  }
 0x153   : > { %v546_v31 = vpack.c.bf16 %v518_v22, %v516_v17  ;;  %v548_v26 = vpack.c.bf16 %v522_v29, %v520_v24 }
 0x155   : > { %v1158_v32 = vpop.eup %1157 }
 0x156   : > { %v509_v20 = vmul.f32 %v1158_v32, %v1136_v47  ;;  %v511_v33 = vmul.f32 %v1158_v32, %v1138_v49  ;;  %v513_v28 = vmul.f32 %v1158_v32, %v1142_v53  ;;  %v515_v36 = vmul.f32 %v1158_v32, %v1146_v57  ;;  %v1116_v47 = vld [vmem:[%s1238_s27 + $0x28] sm:$0xff]   ;;  %v1118_v49 = vld [vmem:[%s1238_s27 + $0x30] sm:$0xff]  }
 0x157   : > { %v517_v37 = vmul.f32 %v1158_v32, %v1148_v60  ;;  %v519_v39 = vmul.f32 %v1158_v32, %v1150_v63  ;;  %v521_v40 = vmul.f32 %v1158_v32, %v1152_v3  ;;  %v523_v34 = vmul.f32 %v1158_v32, %v1154_v6 }
 0x158   : > { %v543_v35 = vpack.c.bf16 %v511_v33, %v509_v20  ;;  %v545_v38 = vpack.c.bf16 %v515_v36, %v513_v28 }
 0x159   : > { %v547_v41 = vpack.c.bf16 %v519_v39, %v517_v37  ;;  %v549_v42 = vpack.c.bf16 %v523_v34, %v521_v40 }
 0x15a   : > { %623 = vmatprep.subr.bf16.mxu0 %v543_v35  ;;  %1069 = vmatprep.subr.bf16.mxu1 %v543_v35 }
 0x15b   : > { %624 = vmatpush1.bf16.msra.mxu0 %v542_v30  ;;  %1073 = vmatpush1.bf16.msra.mxu1 %v542_v30 }
 0x15c   : > { %625 = vmatprep.subr.bf16.mxu0 %v545_v38  ;;  %1070 = vmatprep.subr.bf16.mxu1 %v545_v38 }
 0x15f   : > { %626 = vmatpush1.bf16.msra.mxu0 %v544_v19  ;;  %1074 = vmatpush1.bf16.msra.mxu1 %v544_v19 }
 0x160   : > { %627 = vmatprep.subr.bf16.mxu0 %v547_v41  ;;  %1071 = vmatprep.subr.bf16.mxu1 %v547_v41 }
 0x163   : > { %628 = vmatpush1.bf16.msra.mxu0 %v546_v31  ;;  %1075 = vmatpush1.bf16.msra.mxu1 %v546_v31 }
 0x164   : > { %629 = vmatprep.subr.bf16.mxu0 %v549_v42  ;;  %1072 = vmatprep.subr.bf16.mxu1 %v549_v42 }
 0x167   : > { %630 = vmatpush1.bf16.msra.mxu0 %v548_v26  ;;  %1076 = vmatpush1.bf16.msra.mxu1 %v548_v26 }
 0x16a   : > { %1024 = vmatmul.mubr.msk.bf16.vlgmr.msra.gmra.mrb[0].mxu1 %vm595_vm2, %v1114_v43  ;;  %1021 = vmatmul.mubr.msk.bf16.vlgmr.msra.gmra.mrb[16].mxu0 %vm595_vm2, %v1117_v44 }
 0x16b   : > { %695 = vmatprep.mubr.bf16.mxu1 %v1183_v0  ;;  %665 = vmatprep.mubr.bf16.mxu0 %v1183_v0 }
 0x172   : > { %1025 = vmatmul.mubr.msk.bf16.gmra.mrb[4].mxu1 %vm595_vm2, %v1115_v45  ;;  %1022 = vmatmul.mubr.msk.bf16.gmra.mrb[20].mxu0 %vm595_vm2, %v1119_v46 }
 0x173   : > { %705 = vmatprep.mubr.bf16.mxu1 %v1183_v0  ;;  %675 = vmatprep.mubr.bf16.mxu0 %v1183_v0 }
 0x17a   : > { %1026 = vmatmul.mubr.msk.bf16.gmra.mrb[8].mxu1 %vm595_vm2, %v1116_v47  ;;  %1023 = vmatmul.mubr.msk.bf16.gmra.mrb[24].mxu0 %vm595_vm2, %v1121_v48 }
 0x17b   : > { %715 = vmatprep.mubr.bf16.mxu1 %v1183_v0 }
 0x182   : > { %1027 = vmatmul.mubr.msk.bf16.gmra.mrb[12].mxu1 %vm595_vm2, %v1118_v49 }
 0x183   : > { %725 = vmatprep.mubr.bf16.mxu1 %v1183_v0 }
 0x18a   : > { %1028 = vmatmul.mubr.msk.bf16.gmra.mrb[16].mxu1 %vm595_vm2, %v1120_v50 }
 0x18b   : > { %735 = vmatprep.mubr.bf16.mxu1 %v1183_v0 }
 0x192   : > { %1029 = vmatmul.mubr.msk.bf16.gmra.mrb[20].mxu1 %vm595_vm2, %v1122_v51 }
 0x23d   : > { %v687_v52 = vpop.f32.mrb[0].mxu1  ;;  %v657_v53 = vpop.f32.mrb[16].mxu0 }
 0x23e   : > { %v689_v54 = vpop.f32.mrb[1].mxu1  ;;  %v659_v55 = vpop.f32.mrb[17].mxu0 }
 0x23f   : > { %v1057_v56 = vpack.c.bf16 %v689_v54, %v687_v52  ;;  %v691_v57 = vpop.f32.mrb[2].mxu1  ;;  %v1051_v0 = vpack.c.bf16 %v659_v55, %v657_v53  ;;  %v661_v58 = vpop.f32.mrb[18].mxu0 }
 0x240   : > { %v693_v59 = vpop.f32.mrb[3].mxu1  ;;  %v663_v60 = vpop.f32.mrb[19].mxu0 }
 0x241   : > { %860 = vst [vmem:[%s1309_s4 + $0x30] sm:$0xff] %v1057_v56  ;;  %v1058_v61 = vpack.c.bf16 %v693_v59, %v691_v57  ;;  %854 = vst [vmem:[%s1309_s4] sm:$0xff] %v1051_v0  ;;  %v1052_v62 = vpack.c.bf16 %v663_v60, %v661_v58 }
 0x243   : > { %861 = vst [vmem:[%s1309_s4 + $0x38] sm:$0xff] %v1058_v61  ;;  %855 = vst [vmem:[%s1309_s4 + $0x8] sm:$0xff] %v1052_v62 }
 0x245   : > { %v697_v63 = vpop.f32.mrb[4].mxu1  ;;  %v667_v1 = vpop.f32.mrb[20].mxu0 }
 0x246   : > { %v699_v2 = vpop.f32.mrb[5].mxu1  ;;  %v669_v3 = vpop.f32.mrb[21].mxu0 }
 0x247   : > { %v1059_v4 = vpack.c.bf16 %v699_v2, %v697_v63  ;;  %v701_v5 = vpop.f32.mrb[6].mxu1  ;;  %v1053_v6 = vpack.c.bf16 %v669_v3, %v667_v1  ;;  %v671_v7 = vpop.f32.mrb[22].mxu0 }
 0x248   : > { %v703_v8 = vpop.f32.mrb[7].mxu1  ;;  %v673_v9 = vpop.f32.mrb[23].mxu0 }
 0x249   : > { %862 = vst [vmem:[%s1309_s4 + $0x40] sm:$0xff] %v1059_v4  ;;  %v1060_v10 = vpack.c.bf16 %v703_v8, %v701_v5  ;;  %856 = vst [vmem:[%s1309_s4 + $0x10] sm:$0xff] %v1053_v6  ;;  %v1054_v11 = vpack.c.bf16 %v673_v9, %v671_v7 }
 0x24b   : > { %863 = vst [vmem:[%s1309_s4 + $0x48] sm:$0xff] %v1060_v10  ;;  %857 = vst [vmem:[%s1309_s4 + $0x18] sm:$0xff] %v1054_v11 }
 0x24d   : > { %v707_v12 = vpop.f32.mrb[8].mxu1  ;;  %v677_v13 = vpop.f32.mrb[24].mxu0 }
 0x24e   : > { %v709_v14 = vpop.f32.mrb[9].mxu1  ;;  %v679_v15 = vpop.f32.mrb[25].mxu0 }
 0x24f   : > { %v1061_v18 = vpack.c.bf16 %v709_v14, %v707_v12  ;;  %v711_v21 = vpop.f32.mrb[10].mxu1  ;;  %v1055_v23 = vpack.c.bf16 %v679_v15, %v677_v13  ;;  %v681_v25 = vpop.f32.mrb[26].mxu0 }
 0x250   : > { %v713_v27 = vpop.f32.mrb[11].mxu1  ;;  %v683_v16 = vpop.f32.mrb[27].mxu0 }
 0x251   : > { %864 = vst [vmem:[%s1309_s4 + $0x50] sm:$0xff] %v1061_v18  ;;  %v1062_v17 = vpack.c.bf16 %v713_v27, %v711_v21  ;;  %858 = vst [vmem:[%s1309_s4 + $0x20] sm:$0xff] %v1055_v23  ;;  %v1056_v22 = vpack.c.bf16 %v683_v16, %v681_v25 }
 0x253   : > { %865 = vst [vmem:[%s1309_s4 + $0x58] sm:$0xff] %v1062_v17  ;;  %859 = vst [vmem:[%s1309_s4 + $0x28] sm:$0xff] %v1056_v22 }
 0x255   : > { %v717_v24 = vpop.f32.mrb[12].mxu1 }
 0x256   : > { %v719_v29 = vpop.f32.mrb[13].mxu1 }
 0x257   : > { %v1063_v30 = vpack.c.bf16 %v719_v29, %v717_v24  ;;  %v721_v19 = vpop.f32.mrb[14].mxu1 }
 0x258   : > { %v723_v31 = vpop.f32.mrb[15].mxu1 }
 0x259   : > { %866 = vst [vmem:[%s1309_s4 + $0x60] sm:$0xff] %v1063_v30  ;;  %v1064_v26 = vpack.c.bf16 %v723_v31, %v721_v19 }
 0x25b   : > { %867 = vst [vmem:[%s1309_s4 + $0x68] sm:$0xff] %v1064_v26 }
 0x25d   : > { %v727_v32 = vpop.f32.mrb[16].mxu1 }
 0x25e   : > { %v729_v20 = vpop.f32.mrb[17].mxu1 }
 0x25f   : > { %v1065_v33 = vpack.c.bf16 %v729_v20, %v727_v32  ;;  %v731_v28 = vpop.f32.mrb[18].mxu1 }
 0x260   : > { %v733_v36 = vpop.f32.mrb[19].mxu1 }
 0x261   : > { %868 = vst [vmem:[%s1309_s4 + $0x70] sm:$0xff] %v1065_v33  ;;  %v1066_v37 = vpack.c.bf16 %v733_v36, %v731_v28 }
 0x263   : > { %869 = vst [vmem:[%s1309_s4 + $0x78] sm:$0xff] %v1066_v37 }
 0x265   : > { %v737_v39 = vpop.f32.mrb[20].mxu1 }
 0x266   : > { %v739_v40 = vpop.f32.mrb[21].mxu1 }
 0x267   : > { %v1067_v34 = vpack.c.bf16 %v739_v40, %v737_v39  ;;  %v741_v35 = vpop.f32.mrb[22].mxu1 }
 0x268   : > { %v743_v38 = vpop.f32.mrb[23].mxu1 }
 0x269   : > { %870 = vst [vmem:[%s1309_s4 + $0x80] sm:$0xff] %v1067_v34  ;;  %v1068_v41 = vpack.c.bf16 %v743_v38, %v741_v35 }
 0x26b   : > { %871 = vst [vmem:[%s1309_s4 + $0x88] sm:$0xff] %v1068_v41 }
 0x26c PF: > { %s13_s14 = sadd.s32 1, %s1181_s14   ;;  %s1342_s12 = smov %s1177_s13 }
 0x26d   : > { %p10_p5 = scmp.ge.s32.totalorder %s13_s14, 4   ;;  %s1343_s13 = smov %s1345_s15 }
 0x26f   :  { %12 = sbr.rel (!%p10_p5) target bundleno = 2 (0x2), region = 68 }

// kernel: recurrent_projection.5
= control target key start
LH: loop header
LB: loop body
LE: loop exit
PB: predicated region body
PF: predicated region fallthrough
CT: control target
= control target key end

     0   :  { %s509_s15 = smov 0   ;;  %s511_s16 = smov 0   ;;  %s555_s0 = inlined_call_operand.vmem [shape: bf16[2,4,256], index: 0, kind: input, shape index: {}]   ;;  %s556_s1 = inlined_call_operand.vmem [shape: bf16[8,4], index: 1, kind: input, shape index: {}]   ;;  %s557_s2 = inlined_call_operand.vmem [shape: f32[8,1], index: 2, kind: input, shape index: {}]   ;;  %s558_s3 = inlined_call_operand.vmem [shape: f32[8,1], index: 3, kind: input, shape index: {}]   ;;  %s559_s4 = inlined_call_operand.vmem [shape: bf16[2,8,256], index: 4, kind: output, shape index: {}]  }
   0x1   :  { %s513_s17 = smov 0  }
   0x2 LB: > { %s26_s18 = sadd.s32 1, %s477_s16  ;;  %p419_p0 = scmp.ge.s32.totalorder %s481_s17, 1  ;;  %s481_s17 = sphi %s513_s17, %s14_s17   ;;  %s477_s16 = sphi %s511_s16, %s561_s16   ;;  %s473_s15 = sphi %s509_s15, %s560_s15  }
   0x3   : > { %p28_p1 = scmp.ge.s32.totalorder %s26_s18, 2  ;;  %p183_p2 = scmp.lt.s32.totalorder %s481_s17, 3 }
   0x5   : > { %s563_s18 = smov (%p28_p1, %s26_s18), 0  ;;  %p184_p3 = pnand %p419_p0, %p183_p2 }
   0x6   : > { %p218_p4 = scmp.lt.s32.totalorder (!%p184_p3), %s473_s15, 1  ;;  %v483_v0 = vmov (!%p184_p3), 0   ;;  %v240_v1 = vld [vmem:[%s557_s2] sm:$0xff] (!%p184_p3)  ;;  %vm259_vm0 = vcmask (!%p184_p3), 1041408   ;;  %vm255_vm1 = vcmask (!%p184_p3), 31744  }
   0x7   : > { %187 = sbr.rel (%p184_p3) target bundleno = 245 (0xf5), region = 36  ;;  %298 = vmatprep.mubr.bf16.mxu0 (!%p184_p3), %v483_v0  ;;  %458 = vset.pattern.permute.xlu0 (!%p184_p3), %v483_v0  ;;  %v309_v2 = vld [vmem:[%s558_s3] sm:$0xff] (!%p184_p3) }
   0x8   : > { %243 = vperm.xlu0 (!%p184_p3), %458, %v240_v1   ;;  %v238_v6 = vld [vmem:[%s556_s1] sm:$0xf] (!%p184_p3) }
   0xc   : > { %312 = vperm.xlu0 (!%p184_p3), %458, %v309_v2  }
   0xe   : > { %s565_s15 = smov (!%p218_p4, %s473_s15), 1 }
   0xf   : > { %s430_s23 = sshll.u32 %s565_s15, 2  ;;  %s431_s29 = sshll.u32 %s565_s15, 3 }
  0x10   : > { %s225_s26 = scalar_lea.vmem %s555_s0, %s430_s23  ;;  %s235_s6 = scalar_lea.vmem %s559_s4, %s431_s29 }
  0x11   : > { %v424_v3 = vld.sshfl [vmem:[%s225_s26] sm:$0x33 pattern:$0x76325410] }
  0x12   : > { %v254_v4 = vcombine.high %v424_v3, %v424_v3  ;;  %v261_v5 = vsel %vm259_vm0, %v424_v3, 0 }
  0x14   : > { %425 = vmatprep.subr.msk.bf16.mxu0 %vm259_vm0, %v254_v4 }
  0x15   : > { %267 = vmatpush1.bf16.msra.mxu0 %v261_v5 }
  0x18   : > { %426 = vmatmul.mubr.msk.bf16.vlgmr.msra.gmra.mrb[0].mxu0 %vm255_vm1, %v238_v6 }
  0x87   : > { %v244_v7 = vpop.permute.xlu0 %243 }
  0x8b   : > { %v313_v11 = vpop.permute.xlu0 %312 }
  0xeb   : > { %v300_v8 = vpop.f32.mrb[0].mxu0 }
  0xec   : > { %v301_v9 = vadd.f32 %v300_v8, %v244_v7  ;;  %v302_v10 = vpop.f32.mrb[1].mxu0 }
  0xed   : > { %v303_v12 = vadd.f32 %v302_v10, %v244_v7  ;;  %v304_v13 = vpop.f32.mrb[2].mxu0 }
  0xee   : > { %vm307_vm2 = vcmp.ge.f32.partialorder %v301_v9, 0.0  ;;  %v315_v14 = vmul.f32 %v313_v11, %v301_v9  ;;  %v305_v15 = vpop.f32.mrb[3].mxu0 }
  0xef   : > { %vm308_vm3 = vcmp.ge.f32.partialorder %v303_v12, 0.0  ;;  %v316_v16 = vmul.f32 %v313_v11, %v303_v12 }
  0xf0   : > { %v317_v17 = vsel %vm307_vm2, %v301_v9, %v315_v14 }
  0xf1   : > { %v318_v18 = vsel %vm308_vm3, %v303_v12, %v316_v16 }
  0xf2   : > { %v432_v19 = vpack.c.bf16 %v318_v18, %v317_v17 }
  0xf4   : > { %327 = vst [vmem:[%s235_s6] sm:$0xff] %v432_v19 }
  0xf5 PF: > { %s14_s17 = sadd.s32 1, %s481_s17   ;;  %s560_s15 = smov %s477_s16 }
  0xf6   : > { %p11_p5 = scmp.ge.s32.totalorder %s14_s17, 4   ;;  %s561_s16 = smov %s563_s18 }
  0xf8   :  { %13 = sbr.rel (!%p11_p5) target bundleno = 2 (0x2), region = 66 }

// kernel: recurrent_projection.6
= control target key start
LH: loop header
LB: loop body
LE: loop exit
PB: predicated region body
PF: predicated region fallthrough
CT: control target
= control target key end

     0   :  { %s1436_s12 = smov 0   ;;  %s1438_s13 = smov 0   ;;  %s2411_s0 = inlined_call_operand.vmem [shape: bf16[2,2,256], index: 0, kind: input, shape index: {}]   ;;  %s2412_s1 = inlined_call_operand.vmem [shape: bf16[2,2,256], index: 1, kind: input, shape index: {}]   ;;  %s2413_s2 = inlined_call_operand.vmem [shape: bf16[2,4,256], index: 2, kind: input, shape index: {}]   ;;  %s2414_s3 = inlined_call_operand.vmem [shape: bf16[2,4,256], index: 3, kind: output, shape index: {}]  }
   0x1   :  { %s1440_s14 = smov 0  }
   0x2 LB: > { %s25_s15 = sadd.s32 1, %s1408_s13  ;;  %p1199_p0 = scmp.ge.s32.totalorder %s1412_s14, 1  ;;  %s1412_s14 = sphi %s1440_s14, %s13_s14   ;;  %s1408_s13 = sphi %s1438_s13, %s2613_s13   ;;  %s1404_s12 = sphi %s1436_s12, %s2612_s12  }
   0x3   : > { %p27_p1 = scmp.ge.s32.totalorder %s25_s15, 2  ;;  %p176_p2 = scmp.lt.s32.totalorder %s1412_s14, 3 }
   0x5   : > { %s2615_s15 = smov (%p27_p1, %s25_s15), 0  ;;  %p177_p3 = pnand %p1199_p0, %p176_p2 }
   0x7   : > { %180 = sbr.rel (%p177_p3) target bundleno = 891 (0x37b), region = 32 }
   0xe   : > { %p217_p4 = scmp.lt.s32.totalorder %s1404_s12, 1  ;;  %v260_v0 = vlaneseq  ;;  %v1414_v1 = vmov 1966171168   ;;  %v1415_v3 = vmov 0   ;;  %vm377_vm0 = vcmask 1040384  }
   0xf   : > { %v258_v2 = vunpack.c.l.s4 %v1414_v1  ;;  %416 = vmatprep.mubr.bf16.mxu0 %v1415_v3  ;;  %vm328_vm1 = vcmask 15360  }
  0x10   : > { %s2617_s12 = smov (!%p217_p4, %s1404_s12), 1  ;;  %v261_v4 = vshrl.u32 %v260_v0, 7 }
  0x11   : > { %v259_v5 = vunpack.c.0.s8 %v258_v2  ;;  %s1200_s16 = sshll.u32 %s2617_s12, 1  ;;  %s1230_s23 = sshll.u32 %s2617_s12, 2 }
  0x12   : > { %s228_s19 = scalar_lea.vmem %s2412_s1, %s1200_s16  ;;  %s223_s22 = scalar_lea.vmem %s2411_s0, %s1200_s16 }
  0x13   : > { %v262_v6 = vsub.s32 %v259_v5, %v261_v4  ;;  %v1206_v7 = vld.sshfl [vmem:[%s228_s19] sm:$0x11 pattern:$0x75316420]  ;;  %s233_s26 = scalar_lea.vmem %s2413_s2, %s1230_s23  ;;  %s242_s29 = scalar_lea.vmem %s2414_s3, %s1230_s23 }
  0x14   : > { %v1207_v9 = vld.sshfl [vmem:[%s223_s22] sm:$0x11 pattern:$0x75316420]  ;;  %v256_v14 = vcombine.high %v1206_v7, %v1206_v7 }
  0x15   : > { %v263_v8 = vrot.slane %v1206_v7, %v262_v6  ;;  %v313_v10 = vcombine.high %v1207_v9, %v1207_v9  ;;  %v320_v11 = vrot.slane %v1207_v9, %v262_v6 }
  0x16   : > { %v270_v15 = vrot.slane %v256_v14, %v262_v6 }
  0x17   : > { %273 = vxpose.xlu0.c.b16.start.end [1/1] (short) %v263_v8, 128  ;;  %v327_v12 = vrot.slane %v313_v10, %v262_v6  ;;  %v379_v13 = vsel %vm377_vm0, %v320_v11, 0 }
  0x19   : > { %1208 = vmatprep.subr.msk.bf16.mxu0 %vm377_vm0, %v327_v12 }
  0x1a   : > { %385 = vmatpush1.bf16.msra.mxu0 %v379_v13 }
  0x34   : > { %289 = vxpose.xlu0.c.b16.start.end [1/1] (short) %v270_v15, 128 }
  0x7d   : > { %v281_v16 = vpop.trf.xlu0 }
  0x7e   : > { %1209 = vmatmul.mubr.msk.bf16.vlgmr.msra.gmra.mrb[0].mxu0 %vm328_vm1, %v281_v16 }
  0x7f   : > { %426 = vmatprep.mubr.bf16.mxu0 %v1415_v3 }
  0x81   : > { %v282_v17 = vpop.trf.xlu0 }
  0x85   : > { %v283_v18 = vpop.trf.xlu0 }
  0x86   : > { %1210 = vmatmul.mubr.msk.bf16.gmra.mrb[4].mxu0 %vm328_vm1, %v282_v17 }
  0x87   : > { %436 = vmatprep.mubr.bf16.mxu0 %v1415_v3 }
  0x89   : > { %v284_v19 = vpop.trf.xlu0 }
  0x8d   : > { %v285_v20 = vpop.trf.xlu0 }
  0x8e   : > { %1211 = vmatmul.mubr.msk.bf16.gmra.mrb[8].mxu0 %vm328_vm1, %v283_v18 }
  0x8f   : > { %446 = vmatprep.mubr.bf16.mxu0 %v1415_v3 }
  0x91   : > { %v286_v21 = vpop.trf.xlu0 }
  0x95   : > { %v287_v22 = vpop.trf.xlu0 }
  0x96   : > { %1212 = vmatmul.mubr.msk.bf16.gmra.mrb[12].mxu0 %vm328_vm1, %v284_v19 }
  0x97   : > { %456 = vmatprep.mubr.bf16.mxu0 %v1415_v3 }
  0x99   : > { %v288_v23 = vpop.trf.xlu0 }
  0x9d   : > { %v297_v24 = vpop.trf.xlu0 }
  0x9e   : > { %1213 = vmatmul.mubr.msk.bf16.gmra.mrb[16].mxu0 %vm328_vm1, %v285_v20 }
  0x9f   : > { %466 = vmatprep.mubr.bf16.mxu0 %v1415_v3 }
  0xa1   : > { %v298_v25 = vpop.trf.xlu0 }
  0xa5   : > { %v299_v26 = vpop.trf.xlu0 }
  0xa6   : > { %1214 = vmatmul.mubr.msk.bf16.gmra.mrb[20].mxu0 %vm328_vm1, %v286_v21 }
  0xa7   : > { %476 = vmatprep.mubr.bf16.mxu0 %v1415_v3 }
  0xa9   : > { %v300_v27 = vpop.trf.xlu0 }
  0xad   : > { %v301_v28 = vpop.trf.xlu0 }
  0xae   : > { %1215 = vmatmul.mubr.msk.bf16.gmra.mrb[24].mxu0 %vm328_vm1, %v287_v22 }
  0xaf   : > { %486 = vmatprep.mubr.bf16.mxu0 %v1415_v3 }
  0xb1   : > { %v302_v29 = vpop.trf.xlu0 }
  0xb5   : > { %v303_v30 = vpop.trf.xlu0 }
  0xb6   : > { %1216 = vmatmul.mubr.msk.bf16.gmra.mrb[28].mxu0 %vm328_vm1, %v288_v23 }
  0xb7   : > { %496 = vmatprep.mubr.bf16.mxu0 %v1415_v3 }
  0xb9   : > { %v304_v31 = vpop.trf.xlu0 }
  0xbe   : > { %1217 = vmatmul.mubr.msk.bf16.gmra.mrb[32].mxu0 %vm328_vm1, %v297_v24 }
  0xbf   : > { %506 = vmatprep.mubr.bf16.mxu0 %v1415_v3 }
  0xc6   : > { %1218 = vmatmul.mubr.msk.bf16.gmra.mrb[36].mxu0 %vm328_vm1, %v298_v25 }
  0xc7   : > { %516 = vmatprep.mubr.bf16.mxu0 %v1415_v3 }
  0xce   : > { %1219 = vmatmul.mubr.msk.bf16.gmra.mrb[40].mxu0 %vm328_vm1, %v299_v26 }
  0xcf   : > { %526 = vmatprep.mubr.bf16.mxu0 %v1415_v3 }
  0xd6   : > { %1220 = vmatmul.mubr.msk.bf16.gmra.mrb[44].mxu0 %vm328_vm1, %v300_v27 }
  0xd7   : > { %536 = vmatprep.mubr.bf16.mxu0 %v1415_v3 }
  0xde   : > { %1221 = vmatmul.mubr.msk.bf16.gmra.mrb[48].mxu0 %vm328_vm1, %v301_v28 }
  0xdf   : > { %546 = vmatprep.mubr.bf16.mxu0 %v1415_v3 }
  0xe6   : > { %1222 = vmatmul.mubr.msk.bf16.gmra.mrb[52].mxu0 %vm328_vm1, %v302_v29 }
  0xe7   : > { %556 = vmatprep.mubr.bf16.mxu0 %v1415_v3 }
  0xee   : > { %1223 = vmatmul.mubr.msk.bf16.gmra.mrb[56].mxu0 %vm328_vm1, %v303_v30 }
  0xef   : > { %566 = vmatprep.mubr.bf16.mxu0 %v1415_v3 }
  0xf6   : > { %1224 = vmatmul.mubr.msk.bf16.gmra.mrb[60].mxu0 %vm328_vm1, %v304_v31 }
 0x151   : > { %v1495_v32 = vpop.f32.mrb[0].mxu0 }
 0x152   : > { %v1497_v33 = vpop.f32.mrb[1].mxu0 }
 0x153   : > { %v1499_v34 = vpop.f32.mrb[2].mxu0 }
 0x154   : > { %v1501_v35 = vpop.f32.mrb[3].mxu0 }
 0x159   : > { %v1503_v36 = vpop.f32.mrb[4].mxu0 }
 0x15a   : > { %v577_v37 = vmax.f32 %v1495_v32, %v1503_v36  ;;  %v1507_v38 = vpop.f32.mrb[5].mxu0 }
 0x15b   : > { %v614_v39 = vmax.f32 %v1497_v33, %v1507_v38  ;;  %v1511_v40 = vpop.f32.mrb[6].mxu0 }
 0x15c   : > { %v578_v41 = vmax.f32 %v1499_v34, %v1511_v40  ;;  %v1515_v42 = vpop.f32.mrb[7].mxu0 }
 0x15d   : > { %v615_v43 = vmax.f32 %v1501_v35, %v1515_v42 }
 0x161   : > { %v1519_v44 = vpop.f32.mrb[8].mxu0 }
 0x162   : > { %v579_v45 = vmax.f32 %v577_v37, %v1519_v44  ;;  %v1522_v46 = vpop.f32.mrb[9].mxu0 }
 0x163   : > { %v616_v47 = vmax.f32 %v614_v39, %v1522_v46  ;;  %v1525_v48 = vpop.f32.mrb[10].mxu0 }
 0x164   : > { %v580_v49 = vmax.f32 %v578_v41, %v1525_v48  ;;  %v1528_v50 = vpop.f32.mrb[11].mxu0 }
 0x165   : > { %v617_v51 = vmax.f32 %v615_v43, %v1528_v50 }
 0x169   : > { %v1531_v52 = vpop.f32.mrb[12].mxu0 }
 0x16a   : > { %v581_v53 = vmax.f32 %v579_v45, %v1531_v52  ;;  %v1534_v54 = vpop.f32.mrb[13].mxu0 }
 0x16b   : > { %v618_v55 = vmax.f32 %v616_v47, %v1534_v54  ;;  %v1537_v56 = vpop.f32.mrb[14].mxu0 }
 0x16c   : > { %v582_v57 = vmax.f32 %v580_v49, %v1537_v56  ;;  %v1540_v58 = vpop.f32.mrb[15].mxu0 }
 0x16d   : > { %v619_v59 = vmax.f32 %v617_v51, %v1540_v58 }
 0x171   : > { %v1543_v60 = vpop.f32.mrb[16].mxu0 }
 0x172   : > { %v583_v61 = vmax.f32 %v581_v53, %v1543_v60  ;;  %v1546_v62 = vpop.f32.mrb[17].mxu0 }
 0x173   : > { %v620_v63 = vmax.f32 %v618_v55, %v1546_v62  ;;  %v1549_v0 = vpop.f32.mrb[18].mxu0 }
 0x174   : > { %v584_v1 = vmax.f32 %v582_v57, %v1549_v0  ;;  %v1552_v2 = vpop.f32.mrb[19].mxu0 }
 0x175   : > { %v621_v3 = vmax.f32 %v619_v59, %v1552_v2 }
 0x179   : > { %v1555_v4 = vpop.f32.mrb[20].mxu0 }
 0x17a   : > { %v585_v5 = vmax.f32 %v583_v61, %v1555_v4  ;;  %v1558_v6 = vpop.f32.mrb[21].mxu0 }
 0x17b   : > { %v622_v7 = vmax.f32 %v620_v63, %v1558_v6  ;;  %v1561_v8 = vpop.f32.mrb[22].mxu0 }
 0x17c   : > { %v586_v9 = vmax.f32 %v584_v1, %v1561_v8  ;;  %v1564_v10 = vpop.f32.mrb[23].mxu0 }
 0x17d   : > { %2473 = vst [vmem:[#allocation2_spill] sm:$0xff] %v1564_v10  ;;  %v623_v11 = vmax.f32 %v621_v3, %v1564_v10 }
 0x181   : > { %v1567_v12 = vpop.f32.mrb[24].mxu0 }
 0x182   : > { %v587_v13 = vmax.f32 %v585_v5, %v1567_v12  ;;  %v1570_v14 = vpop.f32.mrb[25].mxu0 }
 0x183   : > { %2474 = vst [vmem:[#allocation3_spill] sm:$0xff] %v1570_v14  ;;  %v624_v15 = vmax.f32 %v622_v7, %v1570_v14  ;;  %v1573_v16 = vpop.f32.mrb[26].mxu0 }
 0x184   : > { %v588_v17 = vmax.f32 %v586_v9, %v1573_v16  ;;  %v1576_v18 = vpop.f32.mrb[27].mxu0 }
 0x185   : > { %2475 = vst [vmem:[#allocation4_spill] sm:$0xff] %v1576_v18  ;;  %v625_v19 = vmax.f32 %v623_v11, %v1576_v18 }
 0x189   : > { %v1579_v20 = vpop.f32.mrb[28].mxu0 }
 0x18a   : > { %v589_v21 = vmax.f32 %v587_v13, %v1579_v20  ;;  %v1582_v22 = vpop.f32.mrb[29].mxu0 }
 0x18b   : > { %2476 = vst [vmem:[#allocation5_spill] sm:$0xff] %v1582_v22  ;;  %v626_v23 = vmax.f32 %v624_v15, %v1582_v22  ;;  %v1585_v24 = vpop.f32.mrb[30].mxu0 }
 0x18c   : > { %v590_v25 = vmax.f32 %v588_v17, %v1585_v24  ;;  %v1588_v26 = vpop.f32.mrb[31].mxu0 }
 0x18d   : > { %2477 = vst [vmem:[#allocation6_spill] sm:$0xff] %v1588_v26  ;;  %v627_v27 = vmax.f32 %v625_v19, %v1588_v26 }
 0x191   : > { %v1591_v28 = vpop.f32.mrb[32].mxu0 }
 0x192   : > { %v591_v29 = vmax.f32 %v589_v21, %v1591_v28  ;;  %v1594_v30 = vpop.f32.mrb[33].mxu0 }
 0x193   : > { %2478 = vst [vmem:[#allocation7_spill] sm:$0xff] %v1594_v30  ;;  %v628_v31 = vmax.f32 %v626_v23, %v1594_v30  ;;  %v1597_v37 = vpop.f32.mrb[34].mxu0 }
 0x194   : > { %v592_v39 = vmax.f32 %v590_v25, %v1597_v37  ;;  %v1600_v41 = vpop.f32.mrb[35].mxu0 }
 0x195   : > { %2479 = vst [vmem:[#allocation8_spill] sm:$0xff] %v1600_v41  ;;  %v629_v43 = vmax.f32 %v627_v27, %v1600_v41 }
 0x199   : > { %v1603_v45 = vpop.f32.mrb[36].mxu0 }
 0x19a   : > { %v593_v47 = vmax.f32 %v591_v29, %v1603_v45  ;;  %v1606_v49 = vpop.f32.mrb[37].mxu0 }
 0x19b   : > { %2480 = vst [vmem:[#allocation9_spill] sm:$0xff] %v1606_v49  ;;  %v630_v51 = vmax.f32 %v628_v31, %v1606_v49  ;;  %v1609_v53 = vpop.f32.mrb[38].mxu0 }
 0x19c   : > { %v594_v55 = vmax.f32 %v592_v39, %v1609_v53  ;;  %v1612_v57 = vpop.f32.mrb[39].mxu0 }
 0x19d   : > { %2481 = vst [vmem:[#allocation10_spill] sm:$0xff] %v1612_v57  ;;  %v631_v59 = vmax.f32 %v629_v43, %v1612_v57 }
 0x1a1   : > { %v1615_v61 = vpop.f32.mrb[40].mxu0 }
 0x1a2   : > { %v595_v63 = vmax.f32 %v593_v47, %v1615_v61  ;;  %v1618_v1 = vpop.f32.mrb[41].mxu0 }
 0x1a3   : > { %2482 = vst [vmem:[#allocation11_spill] sm:$0xff] %v1618_v1  ;;  %v632_v3 = vmax.f32 %v630_v51, %v1618_v1  ;;  %v1621_v5 = vpop.f32.mrb[42].mxu0 }
 0x1a4   : > { %v596_v7 = vmax.f32 %v594_v55, %v1621_v5  ;;  %v1624_v9 = vpop.f32.mrb[43].mxu0 }
 0x1a5   : > { %2483 = vst [vmem:[#allocation12_spill] sm:$0xff] %v1624_v9  ;;  %v633_v11 = vmax.f32 %v631_v59, %v1624_v9 }
 0x1a9   : > { %v1627_v13 = vpop.f32.mrb[44].mxu0 }
 0x1aa   : > { %v597_v15 = vmax.f32 %v595_v63, %v1627_v13  ;;  %v1630_v17 = vpop.f32.mrb[45].mxu0 }
 0x1ab   : > { %2484 = vst [vmem:[#allocation13_spill] sm:$0xff] %v1630_v17  ;;  %v634_v19 = vmax.f32 %v632_v3, %v1630_v17  ;;  %v1633_v21 = vpop.f32.mrb[46].mxu0 }
 0x1ac   : > { %v598_v23 = vmax.f32 %v596_v7, %v1633_v21  ;;  %v1636_v25 = vpop.f32.mrb[47].mxu0 }
 0x1ad   : > { %2485 = vst [vmem:[#allocation14_spill] sm:$0xff] %v1636_v25  ;;  %v635_v27 = vmax.f32 %v633_v11, %v1636_v25 }
 0x1b1   : > { %v1639_v29 = vpop.f32.mrb[48].mxu0 }
 0x1b2   : > { %v599_v31 = vmax.f32 %v597_v15, %v1639_v29  ;;  %v1642_v39 = vpop.f32.mrb[49].mxu0 }
 0x1b3   : > { %2486 = vst [vmem:[#allocation15_spill] sm:$0xff] %v1642_v39  ;;  %v636_v43 = vmax.f32 %v634_v19, %v1642_v39  ;;  %v1645_v47 = vpop.f32.mrb[50].mxu0 }
 0x1b4   : > { %v600_v51 = vmax.f32 %v598_v23, %v1645_v47  ;;  %v1648_v55 = vpop.f32.mrb[51].mxu0 }
 0x1b5   : > { %2487 = vst [vmem:[#allocation16_spill] sm:$0xff] %v1648_v55  ;;  %v637_v59 = vmax.f32 %v635_v27, %v1648_v55 }
 0x1b9   : > { %v1651_v63 = vpop.f32.mrb[52].mxu0 }
 0x1ba   : > { %v601_v3 = vmax.f32 %v599_v31, %v1651_v63  ;;  %v1654_v7 = vpop.f32.mrb[53].mxu0 }
 0x1bb   : > { %2488 = vst [vmem:[#allocation17_spill] sm:$0xff] %v1654_v7  ;;  %v638_v11 = vmax.f32 %v636_v43, %v1654_v7  ;;  %v1657_v15 = vpop.f32.mrb[54].mxu0 }
 0x1bc   : > { %v602_v19 = vmax.f32 %v600_v51, %v1657_v15  ;;  %v1660_v39 = vpop.f32.mrb[55].mxu0 }
 0x1bd   : > { %2489 = vst [vmem:[#allocation18_spill] sm:$0xff] %v1660_v39  ;;  %v639_v23 = vmax.f32 %v637_v59, %v1660_v39 }
 0x1c1   : > { %v1663_v25 = vpop.f32.mrb[56].mxu0 }
 0x1c2   : > { %v603_v27 = vmax.f32 %v601_v3, %v1663_v25  ;;  %v1666_v55 = vpop.f32.mrb[57].mxu0 }
 0x1c3   : > { %2490 = vst [vmem:[#allocation19_spill] sm:$0xff] %v1666_v55  ;;  %v640_v31 = vmax.f32 %v638_v11, %v1666_v55  ;;  %v1669_v17 = vpop.f32.mrb[58].mxu0 }
 0x1c4   : > { %v604_v43 = vmax.f32 %v602_v19, %v1669_v17  ;;  %v1672_v7 = vpop.f32.mrb[59].mxu0 }
 0x1c5   : > { %2491 = vst [vmem:[#allocation20_spill] sm:$0xff] %v1672_v7  ;;  %v641_v51 = vmax.f32 %v639_v23, %v1672_v7 }
 0x1c9   : > { %v1675_v9 = vpop.f32.mrb[60].mxu0 }
 0x1ca   : > { %v605_v59 = vmax.f32 %v603_v27, %v1675_v9  ;;  %v1678_v39 = vpop.f32.mrb[61].mxu0 }
 0x1cb   : > { %2492 = vst [vmem:[#allocation21_spill] sm:$0xff] %v1678_v39  ;;  %v642_v3 = vmax.f32 %v640_v31, %v1678_v39  ;;  %v1681_v1 = vpop.f32.mrb[62].mxu0 }
 0x1cc   : > { %v606_v11 = vmax.f32 %v604_v43, %v1681_v1  ;;  %v1684_v55 = vpop.f32.mrb[63].mxu0 }
 0x1cd   : > { %2493 = vst [vmem:[#allocation22_spill] sm:$0xff] %v1684_v55  ;;  %v643_v19 = vmax.f32 %v641_v51, %v1684_v55 }
 0x1ce   : > { %v607_v57 = vmax.f32 %v605_v59, %v606_v11 }
 0x1cf   : > { %v644_v49 = vmax.f32 %v642_v3, %v643_v19 }
 0x1d0   : > { %v608_v41 = vrot.slane %v607_v57, 4 }
 0x1d1   : > { %v645_v23 = vrot.slane %v644_v49, 4 }
 0x1d2   : > { %v609_v7 = vmax.f32 %v607_v57, %v608_v41 }
 0x1d3   : > { %v646_v30 = vmax.f32 %v644_v49, %v645_v23 }
 0x1d4   : > { %v610_v26 = vrot.slane %v609_v7, 2 }
 0x1d5   : > { %v647_v27 = vrot.slane %v646_v30, 2 }
 0x1d6   : > { %v611_v22 = vmax.f32 %v609_v7, %v610_v26 }
 0x1d7   : > { %v648_v18 = vmax.f32 %v646_v30, %v647_v27 }
 0x1d8   : > { %v612_v14 = vrot.slane %v611_v22, 1 }
 0x1d9   : > { %v649_v31 = vrot.slane %v648_v18, 1 }
 0x1da   : > { %v1687_v39 = vmax.f32 %v611_v22, %v612_v14 }
 0x1db   : > { %v1689_v10 = vmax.f32 %v648_v18, %v649_v31 }
 0x1dc   : > { %v651_v43 = vsub.f32 %v1495_v32, %v1687_v39  ;;  %v653_v51 = vsub.f32 %v1499_v34, %v1687_v39  ;;  %v655_v41 = vsub.f32 %v1503_v36, %v1687_v39  ;;  %v657_v49 = vsub.f32 %v1511_v40, %v1687_v39 }
 0x1dd   : > { %v659_v26 = vsub.f32 %v1519_v44, %v1687_v39  ;;  %v661_v14 = vsub.f32 %v1525_v48, %v1687_v39  ;;  %v663_v18 = vsub.f32 %v1531_v52, %v1687_v39  ;;  %v665_v32 = vsub.f32 %v1537_v56, %v1687_v39  ;;  %v2516_v52 = vld [vmem:[#allocation18_spill] sm:$0xff] }
 0x1de   : > { %v667_v34 = vsub.f32 %v1543_v60, %v1687_v39  ;;  %v669_v36 = vsub.f32 %v1549_v0, %v1687_v39  ;;  %v671_v40 = vsub.f32 %v1555_v4, %v1687_v39  ;;  %v673_v44 = vsub.f32 %v1561_v8, %v1687_v39  ;;  %v2509_v4 = vld [vmem:[#allocation13_spill] sm:$0xff]  ;;  %v2512_v60 = vld [vmem:[#allocation15_spill] sm:$0xff] }
 0x1df   : > { %v715_v7 = vmul.f32 1.442695, %v651_v43  ;;  %v719_v19 = vmul.f32 1.442695, %v653_v51  ;;  %v723_v57 = vmul.f32 1.442695, %v655_v41  ;;  %v2521_v8 = vsub.f32 %v1579_v20, %v1687_v39 }
 0x1e0   : > { %v727_v31 = vmul.f32 1.442695, %v657_v49  ;;  %v731_v59 = vmul.f32 1.442695, %v659_v26  ;;  %v735_v30 = vmul.f32 1.442695, %v661_v14  ;;  %v2524_v20 = vsub.f32 %v1597_v37, %v1687_v39 }
 0x1e1   : > { %1258 = vpow2.f32 %v715_v7  ;;  %v739_v3 = vmul.f32 1.442695, %v663_v18  ;;  %v743_v22 = vmul.f32 1.442695, %v665_v32  ;;  %v747_v26 = vmul.f32 1.442695, %v667_v34 }
 0x1e2   : > { %1260 = vpow2.f32 %v719_v19  ;;  %v2496_v34 = vld [vmem:[#allocation2_spill] sm:$0xff]  ;;  %v2497_v18 = vld [vmem:[#allocation3_spill] sm:$0xff]  ;;  %v2498_v32 = vld [vmem:[#allocation4_spill] sm:$0xff]  ;;  %v755_v43 = vmul.f32 1.442695, %v671_v40 }
 0x1e3   : > { %1262 = vpow2.f32 %v723_v57  ;;  %v2500_v7 = vld [vmem:[#allocation5_spill] sm:$0xff]  ;;  %v2503_v14 = vld [vmem:[#allocation8_spill] sm:$0xff]  ;;  %v2507_v51 = vld [vmem:[#allocation11_spill] sm:$0xff]  ;;  %v771_v41 = vmul.f32 1.442695, %v2521_v8 }
 0x1e4   : > { %1264 = vpow2.f32 %v727_v31  ;;  %v751_v31 = vmul.f32 1.442695, %v669_v36  ;;  %v2502_v36 = vld [vmem:[#allocation7_spill] sm:$0xff]  ;;  %v2504_v49 = vld [vmem:[#allocation9_spill] sm:$0xff]  ;;  %v2508_v19 = vld [vmem:[#allocation12_spill] sm:$0xff] }
 0x1e5   : > { %1266 = vpow2.f32 %v731_v59  ;;  %v2501_v59 = vld [vmem:[#allocation6_spill] sm:$0xff]  ;;  %v2513_v40 = vld [vmem:[#allocation16_spill] sm:$0xff]  ;;  %v783_v8 = vmul.f32 1.442695, %v2524_v20 }
 0x1e6   : > { %1268 = vpow2.f32 %v735_v30 }
 0x1e7   : > { %1270 = vpow2.f32 %v739_v3 }
 0x1e8   : > { %1272 = vpow2.f32 %v743_v22  ;;  %v2506_v22 = vld [vmem:[#allocation10_spill] sm:$0xff] }
 0x1e9   : > { %1274 = vpow2.f32 %v747_v26 }
 0x1ea   : > { %1276 = vpow2.f32 %v751_v31  ;;  %v2517_v31 = vld [vmem:[#allocation19_spill] sm:$0xff] }
 0x1eb   : > { %v1767_v57 = vpop.eup %1258  ;;  %1278 = vpow2.f32 %v755_v43 }
 0x1ec   : > { %2494 = vst [vmem:[#allocation23_spill] sm:$0xff] %v1767_v57  ;;  %v1775_v30 = vpop.eup %1260 }
 0x1ed   : > { %2495 = vst [vmem:[#allocation24_spill] sm:$0xff] %v1775_v30  ;;  %v843_v11 = vadd.f32 %v1775_v30, %v1767_v57  ;;  %v1789_v3 = vpop.eup %1262  ;;  %v2520_v57 = vsub.f32 %v1573_v16, %v1687_v39  ;;  %v2523_v16 = vsub.f32 %v1591_v28, %v1687_v39  ;;  %v2526_v28 = vsub.f32 %v1501_v35, %v1689_v10 }
 0x1ee   : > { %2499 = vst [vmem:[#allocation2_spill] sm:$0xff] %v1789_v3  ;;  %v1802_v0 = vpop.eup %1264 }
 0x1ef   : > { %v844_v27 = vadd.f32 %v1789_v3, %v843_v11  ;;  %2505 = vst [vmem:[#allocation3_spill] sm:$0xff] %v1802_v0  ;;  %v759_v11 = vmul.f32 1.442695, %v673_v44  ;;  %v1818_v48 = vpop.eup %1266  ;;  %v2518_v3 = vld [vmem:[#allocation20_spill] sm:$0xff]  ;;  %v2519_v44 = vld [vmem:[#allocation21_spill] sm:$0xff] }
 0x1f0   : > { %2511 = vst [vmem:[#allocation4_spill] sm:$0xff] %v1818_v48  ;;  %v1834_v26 = vpop.eup %1268  ;;  %v767_v30 = vmul.f32 1.442695, %v2520_v57  ;;  %v779_v57 = vmul.f32 1.442695, %v2523_v16 }
 0x1f1   : > { %v845_v23 = vadd.f32 %v1802_v0, %v844_v27  ;;  %v2515_v27 = vsub.f32 %v1567_v12, %v1687_v39  ;;  %1280 = vpow2.f32 %v759_v11 }
 0x1f3   : > { %v763_v0 = vmul.f32 1.442695, %v2515_v27  ;;  %v846_v56 = vadd.f32 %v1818_v48, %v845_v23  ;;  %v1843_v27 = vpop.eup %1270 }
 0x1f4   : > { %v1849_v48 = vpop.eup %1272 }
 0x1f5   : > { %v847_v23 = vadd.f32 %v1834_v26, %v846_v56  ;;  %1282 = vpow2.f32 %v763_v0  ;;  %v1855_v55 = vpop.eup %1274  ;;  %v2522_v56 = vsub.f32 %v1585_v24, %v1687_v39 }
 0x1f6   : > { %1284 = vpow2.f32 %v767_v30  ;;  %v1864_v0 = vpop.eup %1276  ;;  %v2525_v30 = vsub.f32 %v1497_v33, %v1689_v10  ;;  %v2528_v33 = vsub.f32 %v1507_v38, %v1689_v10 }
 0x1f7   : > { %v848_v43 = vadd.f32 %v1843_v27, %v847_v23  ;;  %v775_v11 = vmul.f32 1.442695, %v2522_v56  ;;  %1286 = vpow2.f32 %v771_v41  ;;  %v1873_v56 = vpop.eup %1278  ;;  %v2527_v41 = vsub.f32 %v1603_v45, %v1687_v39 }
 0x1f8   : > { %v717_v24 = vmul.f32 1.442695, %v2525_v30  ;;  %v2531_v45 = vsub.f32 %v1515_v42, %v1689_v10 }
 0x1f9   : > { %v849_v12 = vadd.f32 %v1849_v48, %v848_v43  ;;  %1288 = vpow2.f32 %v775_v11  ;;  %v787_v16 = vmul.f32 1.442695, %v2527_v41  ;;  %v2529_v11 = vsub.f32 %v1609_v53, %v1687_v39 }
 0x1fa   : > { %1290 = vpow2.f32 %v779_v57  ;;  %v2534_v53 = vsub.f32 %v1522_v46, %v1689_v10 }
 0x1fb   : > { %v850_v23 = vadd.f32 %v1855_v55, %v849_v12  ;;  %v721_v12 = vmul.f32 1.442695, %v2526_v28  ;;  %v1882_v20 = vpop.eup %1280  ;;  %1292 = vpow2.f32 %v783_v8  ;;  %v791_v30 = vmul.f32 1.442695, %v2529_v11 }
 0x1fc   : > { %1294 = vpow2.f32 %v717_v24  ;;  %v2532_v8 = vsub.f32 %v1615_v61, %v1687_v39  ;;  %v733_v24 = vmul.f32 1.442695, %v2534_v53  ;;  %v2536_v61 = vsub.f32 %v1528_v50, %v1689_v10 }
 0x1fd   : > { %v851_v43 = vadd.f32 %v1864_v0, %v850_v23  ;;  %v725_v23 = vmul.f32 1.442695, %v2528_v33  ;;  %1296 = vpow2.f32 %v721_v12  ;;  %v2535_v12 = vsub.f32 %v1621_v5, %v1687_v39 }
 0x1fe   : > { %1298 = vpow2.f32 %v787_v16  ;;  %v795_v38 = vmul.f32 1.442695, %v2532_v8  ;;  %v737_v33 = vmul.f32 1.442695, %v2536_v61  ;;  %v2538_v5 = vsub.f32 %v1534_v54, %v1689_v10 }
 0x1ff   : > { %v852_v37 = vadd.f32 %v1873_v56, %v851_v43  ;;  %v1891_v57 = vpop.eup %1282  ;;  %v729_v43 = vmul.f32 1.442695, %v2531_v45  ;;  %1300 = vpow2.f32 %v725_v23  ;;  %v799_v42 = vmul.f32 1.442695, %v2535_v12 }
 0x200   : > { %2530 = vst [vmem:[#allocation5_spill] sm:$0xff] %v1891_v57  ;;  %v1900_v41 = vpop.eup %1284  ;;  %1302 = vpow2.f32 %v791_v30  ;;  %v2537_v23 = vsub.f32 %v1627_v13, %v1687_v39  ;;  %v2539_v50 = vsub.f32 %v1633_v21, %v1687_v39  ;;  %v2541_v54 = vsub.f32 %v1639_v29, %v1687_v39 }
 0x201   : > { %v853_v35 = vadd.f32 %v1882_v20, %v852_v37  ;;  %2533 = vst [vmem:[#allocation6_spill] sm:$0xff] %v1900_v41  ;;  %v1909_v37 = vpop.eup %1286  ;;  %1304 = vpow2.f32 %v729_v43 }
 0x202   : > { %1306 = vpow2.f32 %v795_v38  ;;  %v803_v46 = vmul.f32 1.442695, %v2537_v23  ;;  %v807_v43 = vmul.f32 1.442695, %v2539_v50  ;;  %v2540_v38 = vsub.f32 %v1540_v58, %v1689_v10 }
 0x203   : > { %v854_v28 = vadd.f32 %v1891_v57, %v853_v35  ;;  %v1918_v30 = vpop.eup %1288  ;;  %1308 = vpow2.f32 %v733_v24  ;;  %v741_v35 = vmul.f32 1.442695, %v2538_v5  ;;  %v811_v24 = vmul.f32 1.442695, %v2541_v54 }
 0x204   : > { %v1923_v45 = vpop.eup %1290  ;;  %1310 = vpow2.f32 %v799_v42  ;;  %v2542_v42 = vsub.f32 %v1546_v62, %v1689_v10  ;;  %v2543_v58 = vsub.f32 %v1645_v47, %v1687_v39  ;;  %v2547_v54 = vsub.f32 %v1657_v15, %v1687_v39 }
 0x205   : > { %v855_v16 = vadd.f32 %v1900_v41, %v854_v28  ;;  %v1929_v13 = vpop.eup %1292  ;;  %1312 = vpow2.f32 %v737_v33  ;;  %v745_v28 = vmul.f32 1.442695, %v2540_v38  ;;  %v2546_v38 = vsub.f32 %v1558_v6, %v1689_v10 }
 0x206   : > { %v1934_v53 = vpop.eup %1294  ;;  %1314 = vpow2.f32 %v803_v46  ;;  %v815_v33 = vmul.f32 1.442695, %v2543_v58 }
 0x207   : > { %v856_v11 = vadd.f32 %v1909_v37, %v855_v16  ;;  %v1940_v21 = vpop.eup %1296  ;;  %1316 = vpow2.f32 %v741_v35  ;;  %v749_v16 = vmul.f32 1.442695, %v2542_v42  ;;  %v2545_v35 = vsub.f32 %v1651_v63, %v1687_v39 }
 0x208   : > { %v1945_v61 = vpop.eup %1298  ;;  %1318 = vpow2.f32 %v807_v43  ;;  %v880_v29 = vadd.f32 %v1940_v21, %v1934_v53 }
 0x209   : > { %v857_v8 = vadd.f32 %v1918_v30, %v856_v11  ;;  %v1953_v46 = vpop.eup %1300  ;;  %1320 = vpow2.f32 %v745_v28  ;;  %v2544_v11 = vsub.f32 %v1552_v2, %v1689_v10  ;;  %v819_v47 = vmul.f32 1.442695, %v2545_v35 }
 0x20a   : > { %v1958_v5 = vpop.eup %1302  ;;  %1322 = vpow2.f32 %v811_v24  ;;  %v881_v43 = vadd.f32 %v1953_v46, %v880_v29  ;;  %v757_v28 = vmul.f32 1.442695, %v2546_v38  ;;  %v823_v24 = vmul.f32 1.442695, %v2547_v54 }
 0x20b   : > { %v858_v12 = vadd.f32 %v1923_v45, %v857_v8  ;;  %v753_v62 = vmul.f32 1.442695, %v2544_v11  ;;  %v1965_v8 = vpop.eup %1304  ;;  %1324 = vpow2.f32 %v749_v16  ;;  %v2548_v16 = vsub.f32 %v2496_v34, %v1689_v10 }
 0x20c   : > { %v1970_v2 = vpop.eup %1306  ;;  %1326 = vpow2.f32 %v815_v33  ;;  %v2549_v33 = vsub.f32 %v1663_v25, %v1687_v39 }
 0x20d   : > { %v859_v23 = vadd.f32 %v1929_v13, %v858_v12  ;;  %v882_v12 = vadd.f32 %v1965_v8, %v881_v43  ;;  %v1977_v42 = vpop.eup %1308  ;;  %1328 = vpow2.f32 %v753_v62  ;;  %v761_v58 = vmul.f32 1.442695, %v2548_v16 }
 0x20e   : > { %v1982_v6 = vpop.eup %1310  ;;  %1330 = vpow2.f32 %v819_v47  ;;  %v2550_v62 = vsub.f32 %v2497_v18, %v1689_v10  ;;  %v2551_v47 = vsub.f32 %v1669_v17, %v1687_v39 }
 0x20f   : > { %v860_v50 = vadd.f32 %v1945_v61, %v859_v23  ;;  %v827_v23 = vmul.f32 1.442695, %v2549_v33  ;;  %v883_v29 = vadd.f32 %v1977_v42, %v882_v12  ;;  %v1989_v11 = vpop.eup %1312  ;;  %1332 = vpow2.f32 %v757_v28 }
 0x210   : > { %v765_v35 = vmul.f32 1.442695, %v2550_v62  ;;  %v1994_v34 = vpop.eup %1314  ;;  %1334 = vpow2.f32 %v823_v24  ;;  %v2552_v28 = vsub.f32 %v2498_v32, %v1689_v10  ;;  %v2553_v24 = vsub.f32 %v1675_v9, %v1687_v39 }
 0x211   : > { %v861_v63 = vadd.f32 %v1958_v5, %v860_v50  ;;  %v831_v50 = vmul.f32 1.442695, %v2551_v47  ;;  %v884_v43 = vadd.f32 %v1989_v11, %v883_v29  ;;  %v2001_v38 = vpop.eup %1316  ;;  %1336 = vpow2.f32 %v761_v58 }
 0x212   : > { %v769_v54 = vmul.f32 1.442695, %v2552_v28  ;;  %v2006_v18 = vpop.eup %1318  ;;  %1338 = vpow2.f32 %v827_v23  ;;  %v2554_v58 = vsub.f32 %v2500_v7, %v1689_v10  ;;  %v2555_v23 = vsub.f32 %v1681_v1, %v1687_v39 }
 0x213   : > { %v862_v15 = vadd.f32 %v1970_v2, %v861_v63  ;;  %v835_v63 = vmul.f32 1.442695, %v2553_v24  ;;  %v885_v12 = vadd.f32 %v2001_v38, %v884_v43  ;;  %v2013_v16 = vpop.eup %1320  ;;  %1340 = vpow2.f32 %v765_v35 }
 0x214   : > { %v773_v33 = vmul.f32 1.442695, %v2554_v58  ;;  %v2018_v32 = vpop.eup %1322  ;;  %1342 = vpow2.f32 %v831_v50  ;;  %v2556_v35 = vsub.f32 %v2501_v59, %v1689_v10  ;;  %v2557_v39 = vsub.f32 %v2502_v36, %v1689_v10 }
 0x215   : > { %v863_v25 = vadd.f32 %v1982_v6, %v862_v15  ;;  %v839_v15 = vmul.f32 1.442695, %v2555_v23  ;;  %v886_v29 = vadd.f32 %v2013_v16, %v885_v12  ;;  %v2025_v62 = vpop.eup %1324  ;;  %1344 = vpow2.f32 %v769_v54 }
 0x216   : > { %v777_v47 = vmul.f32 1.442695, %v2556_v35  ;;  %v2030_v7 = vpop.eup %1326  ;;  %1346 = vpow2.f32 %v835_v63  ;;  %v781_v43 = vmul.f32 1.442695, %v2557_v39  ;;  %v2558_v63 = vsub.f32 %v2503_v14, %v1689_v10 }
 0x217   : > { %v864_v17 = vadd.f32 %v1994_v34, %v863_v25  ;;  %v887_v25 = vadd.f32 %v2025_v62, %v886_v29  ;;  %v2034_v1 = vpop.eup %1328  ;;  %1348 = vpow2.f32 %v773_v33  ;;  %v2559_v23 = vsub.f32 %v2504_v49, %v1689_v10 }
 0x218   : > { %v2039_v28 = vpop.eup %1330  ;;  %1350 = vpow2.f32 %v839_v15 }
 0x219   : > { %v865_v9 = vadd.f32 %v2006_v18, %v864_v17  ;;  %v888_v54 = vadd.f32 %v2034_v1, %v887_v25  ;;  %v2043_v24 = vpop.eup %1332  ;;  %1352 = vpow2.f32 %v777_v47  ;;  %v785_v17 = vmul.f32 1.442695, %v2558_v63 }
 0x21a   : > { %v2048_v12 = vpop.eup %1334  ;;  %1354 = vpow2.f32 %v781_v43  ;;  %v789_v15 = vmul.f32 1.442695, %v2559_v23  ;;  %v2561_v47 = vsub.f32 %v2506_v22, %v1689_v10 }
 0x21b   : > { %v866_v50 = vadd.f32 %v2018_v32, %v865_v9  ;;  %v889_v58 = vadd.f32 %v2043_v24, %v888_v54  ;;  %v2052_v33 = vpop.eup %1336  ;;  %1356 = vpow2.f32 %v785_v17 }
 0x21c   : > { %v2057_v9 = vpop.eup %1338  ;;  %1358 = vpow2.f32 %v789_v15 }
 0x21d   : > { %v867_v59 = vadd.f32 %v2030_v7, %v866_v50  ;;  %v890_v29 = vadd.f32 %v2052_v33, %v889_v58  ;;  %v2061_v35 = vpop.eup %1340  ;;  %v793_v50 = vmul.f32 1.442695, %v2561_v47 }
 0x21e   : > { %2560 = vst [vmem:[#allocation7_spill] sm:$0xff] %v2061_v35  ;;  %v2066_v25 = vpop.eup %1342 }
 0x21f   : > { %v868_v36 = vadd.f32 %v2039_v28, %v867_v59  ;;  %v891_v49 = vadd.f32 %v2061_v35, %v890_v29  ;;  %v2071_v43 = vpop.eup %1344  ;;  %v2563_v59 = vsub.f32 %v2507_v51, %v1689_v10  ;;  %1360 = vpow2.f32 %v793_v50 }
 0x220   : > { %2562 = vst [vmem:[#allocation8_spill] sm:$0xff] %v2071_v43  ;;  %v2081_v22 = vpop.eup %1346  ;;  %v2565_v51 = vsub.f32 %v2508_v19, %v1689_v10 }
 0x221   : > { %v869_v14 = vadd.f32 %v2048_v12, %v868_v36  ;;  %v797_v54 = vmul.f32 1.442695, %v2563_v59  ;;  %v892_v17 = vadd.f32 %v2071_v43, %v891_v49  ;;  %v2085_v36 = vld.sshfl [vmem:[%s233_s26] sm:$0x33 pattern:$0x76325410]  ;;  %v2087_v58 = vpop.eup %1348  ;;  %v2566_v49 = vsub.f32 %v2509_v4, %v1689_v10 }
 0x222   : > { %2564 = vst [vmem:[#allocation9_spill] sm:$0xff] %v2085_v36  ;;  %v801_v23 = vmul.f32 1.442695, %v2565_v51  ;;  %v1023_v15 = vcombine.high %v2085_v36, %v2085_v36  ;;  %v2567_v36 = vld [vmem:[#allocation14_spill] sm:$0xff]  ;;  %v2569_v4 = vsub.f32 %v2512_v60, %v1689_v10 }
 0x223   : > { %v870_v39 = vadd.f32 %v2057_v9, %v869_v14  ;;  %v2094_v14 = vpop.eup %1350  ;;  %v893_v47 = vadd.f32 %v2087_v58, %v892_v17  ;;  %1362 = vpow2.f32 %v797_v54  ;;  %v805_v50 = vmul.f32 1.442695, %v2566_v49 }
 0x224   : > { %1058 = vmatprep.mubr.bf16.mxu1 %v1023_v15  ;;  %1364 = vpow2.f32 %v801_v23  ;;  %v813_v15 = vmul.f32 1.442695, %v2569_v4 }
 0x225   : > { %v871_v63 = vadd.f32 %v2066_v25, %v870_v39  ;;  %v2098_v39 = vpop.eup %1352  ;;  %1366 = vpow2.f32 %v805_v50  ;;  %v2571_v50 = vld [vmem:[#allocation17_spill] sm:$0xff] }
 0x226   : > { %v894_v59 = vadd.f32 %v2098_v39, %v893_v47  ;;  %v2105_v51 = vpop.eup %1354  ;;  %v2572_v60 = vsub.f32 %v2571_v50, %v1689_v10 }
 0x227   : > { %v872_v29 = vadd.f32 %v2081_v22, %v871_v63  ;;  %v2568_v63 = vsub.f32 %v2567_v36, %v1689_v10  ;;  %v2111_v54 = vpop.eup %1356  ;;  %v2570_v36 = vsub.f32 %v2513_v40, %v1689_v10  ;;  %v2573_v40 = vsub.f32 %v2516_v52, %v1689_v10 }
 0x228   : > { %v895_v57 = vadd.f32 %v2105_v51, %v894_v59  ;;  %v2117_v49 = vpop.eup %1358  ;;  %v821_v4 = vmul.f32 1.442695, %v2572_v60 }
 0x229   : > { %v873_v19 = vadd.f32 %v2094_v14, %v872_v29  ;;  %v809_v41 = vmul.f32 1.442695, %v2568_v63  ;;  %v817_v23 = vmul.f32 1.442695, %v2570_v36  ;;  %v2123_v43 = vpop.eup %1360 }
 0x22a   : > { %v896_v47 = vadd.f32 %v2111_v54, %v895_v57 }
 0x22b   : > { %v874_v17 = vrot.slane %v873_v19, 4  ;;  %1368 = vpow2.f32 %v809_v41  ;;  %v825_v41 = vmul.f32 1.442695, %v2573_v40 }
 0x22c   : > { %v897_v59 = vadd.f32 %v2117_v49, %v896_v47  ;;  %1370 = vpow2.f32 %v813_v15  ;;  %v2574_v15 = vsub.f32 %v2517_v31, %v1689_v10 }
 0x22d   : > { %v875_v29 = vadd.f32 %v874_v17, %v873_v19  ;;  %v2129_v17 = vpop.eup %1362  ;;  %1372 = vpow2.f32 %v817_v23 }
 0x22e   : > { %v898_v57 = vadd.f32 %v2123_v43, %v897_v59  ;;  %v2135_v35 = vpop.eup %1364  ;;  %1374 = vpow2.f32 %v821_v4  ;;  %v829_v50 = vmul.f32 1.442695, %v2574_v15  ;;  %v2576_v4 = vsub.f32 %v2519_v44, %v1689_v10 }
 0x22f   : > { %v876_v63 = vrot.slane %v875_v29, 2  ;;  %v2144_v59 = vpop.eup %1366  ;;  %1376 = vpow2.f32 %v825_v41 }
 0x230   : > { %v899_v47 = vadd.f32 %v2129_v17, %v898_v57  ;;  %1378 = vpow2.f32 %v829_v50  ;;  %v837_v31 = vmul.f32 1.442695, %v2576_v4 }
 0x231   : > { %v877_v19 = vadd.f32 %v876_v63, %v875_v29  ;;  %v2575_v29 = vsub.f32 %v2518_v3, %v1689_v10 }
 0x232   : > { %v900_v23 = vadd.f32 %v2135_v35, %v899_v47  ;;  %v2577_v47 = vld [vmem:[#allocation22_spill] sm:$0xff] }
 0x233   : > { %v878_v36 = vrot.slane %v877_v19, 1  ;;  %v833_v63 = vmul.f32 1.442695, %v2575_v29  ;;  %v2578_v15 = vsub.f32 %v2577_v47, %v1689_v10 }
 0x234   : > { %v901_v60 = vadd.f32 %v2144_v59, %v900_v23 }
 0x235   : > { %v879_v52 = vadd.f32 %v878_v36, %v877_v19  ;;  %v2147_v57 = vpop.eup %1368  ;;  %1380 = vpow2.f32 %v833_v63  ;;  %v841_v19 = vmul.f32 1.442695, %v2578_v15 }
 0x236   : > { %v902_v40 = vadd.f32 %v2147_v57, %v901_v60  ;;  %v2153_v3 = vpop.eup %1370 }
 0x237   : > { %1382 = vrcp.f32 %v879_v52  ;;  %v2159_v36 = vpop.eup %1372 }
 0x238   : > { %v903_v41 = vadd.f32 %v2153_v3, %v902_v40  ;;  %1384 = vpow2.f32 %v837_v31  ;;  %v2162_v29 = vpop.eup %1374 }
 0x239   : > { %1386 = vpow2.f32 %v841_v19  ;;  %v2165_v63 = vpop.eup %1376 }
 0x23a   : > { %v904_v50 = vadd.f32 %v2159_v36, %v903_v41  ;;  %v2168_v52 = vpop.eup %1378 }
 0x23c   : > { %v905_v44 = vadd.f32 %v2162_v29, %v904_v50 }
 0x23e   : > { %v906_v23 = vadd.f32 %v2165_v63, %v905_v44 }
 0x23f   : > { %v2170_v10 = vpop.eup %1380 }
 0x240   : > { %v907_v60 = vadd.f32 %v2168_v52, %v906_v23 }
 0x241   : > { %v2173_v4 = vpop.eup %1382 }
 0x242   : > { %v908_v31 = vadd.f32 %v2170_v10, %v907_v60  ;;  %v2176_v40 = vpop.eup %1384  ;;  %v2181_v15 = vmul.f32 %v2173_v4, %v1909_v37  ;;  %v2185_v19 = vmul.f32 %v2173_v4, %v1918_v30  ;;  %v2191_v50 = vmul.f32 %v2173_v4, %v1923_v45 }
 0x243   : > { %v2187_v41 = vpop.eup %1386  ;;  %v2195_v44 = vmul.f32 %v2173_v4, %v1929_v13  ;;  %v2202_v60 = vmul.f32 %v2173_v4, %v1945_v61  ;;  %v2206_v30 = vmul.f32 %v2173_v4, %v1958_v5  ;;  %v2212_v13 = vmul.f32 %v2173_v4, %v1970_v2 }
 0x244   : > { %v909_v47 = vadd.f32 %v2176_v40, %v908_v31  ;;  %v2216_v31 = vmul.f32 %v2173_v4, %v1982_v6  ;;  %v2226_v37 = vmul.f32 %v2173_v4, %v2006_v18  ;;  %v2230_v2 = vmul.f32 %v2173_v4, %v2018_v32 }
 0x245   : > { %2579 = vst [vmem:[#allocation10_spill] sm:$0xff] %v2202_v60  ;;  %v2236_v45 = vmul.f32 %v2173_v4, %v2030_v7  ;;  %v2244_v5 = vmul.f32 %v2173_v4, %v2048_v12  ;;  %v2250_v60 = vmul.f32 %v2173_v4, %v2057_v9  ;;  %v2254_v7 = vmul.f32 %v2173_v4, %v2066_v25 }
 0x246   : > { %v910_v23 = vadd.f32 %v2187_v41, %v909_v47  ;;  %v2220_v47 = vmul.f32 %v2173_v4, %v1994_v34  ;;  %2581 = vst [vmem:[#allocation12_spill] sm:$0xff] %v2226_v37  ;;  %2582 = vst [vmem:[#allocation13_spill] sm:$0xff] %v2230_v2  ;;  %v2240_v34 = vmul.f32 %v2173_v4, %v2039_v28  ;;  %v2589_v37 = vld [vmem:[#allocation3_spill] sm:$0xff] }
 0x247   : > { %2583 = vst [vmem:[#allocation15_spill] sm:$0xff] %v2236_v45  ;;  %2585 = vst [vmem:[#allocation18_spill] sm:$0xff] %v2244_v5  ;;  %v2262_v12 = vmul.f32 %v2173_v4, %v2081_v22  ;;  %v2587_v5 = vld [vmem:[#allocation24_spill] sm:$0xff]  ;;  %v2588_v45 = vld [vmem:[#allocation2_spill] sm:$0xff] }
 0x248   : > { %2580 = vst [vmem:[#allocation11_spill] sm:$0xff] %v2220_v47  ;;  %v911_v61 = vrot.slane %v910_v23, 4  ;;  %2584 = vst [vmem:[#allocation16_spill] sm:$0xff] %v2240_v34  ;;  %v2586_v34 = vld [vmem:[#allocation23_spill] sm:$0xff]  ;;  %v923_v47 = vmul.f32 %v2173_v4, %v2588_v45 }
 0x249   : > { %v919_v22 = vmul.f32 %v2173_v4, %v2586_v34 }
 0x24a   : > { %v912_v18 = vadd.f32 %v911_v61, %v910_v23  ;;  %v2266_v23 = vmul.f32 %v2173_v4, %v2094_v14  ;;  %v921_v14 = vmul.f32 %v2173_v4, %v2587_v5  ;;  %v925_v61 = vmul.f32 %v2173_v4, %v2589_v37 }
 0x24c   : > { %v913_v9 = vrot.slane %v912_v18, 2  ;;  %v983_v37 = vpack.c.bf16 %v921_v14, %v919_v22 }
 0x24e   : > { %v914_v32 = vadd.f32 %v913_v9, %v912_v18  ;;  %v2590_v9 = vld [vmem:[#allocation4_spill] sm:$0xff] }
 0x250   : > { %v915_v28 = vrot.slane %v914_v32, 1 }
 0x252   : > { %v916_v2 = vadd.f32 %v915_v28, %v914_v32 }
 0x254   : > { %1388 = vrcp.f32 %v916_v2 }
 0x25e   : > { %v2272_v6 = vpop.eup %1388 }
 0x25f   : > { %v920_v18 = vmul.f32 %v2272_v6, %v1934_v53  ;;  %v922_v2 = vmul.f32 %v2272_v6, %v1940_v21  ;;  %v924_v32 = vmul.f32 %v2272_v6, %v1953_v46  ;;  %v926_v34 = vmul.f32 %v2272_v6, %v1965_v8 }
 0x260   : > { %v928_v5 = vmul.f32 %v2272_v6, %v1977_v42  ;;  %v930_v45 = vmul.f32 %v2272_v6, %v1989_v11  ;;  %v927_v53 = vmul.f32 %v2173_v4, %v2590_v9  ;;  %v929_v21 = vmul.f32 %v2173_v4, %v1834_v26 }
 0x261   : > { %v984_v28 = vpack.c.bf16 %v922_v2, %v920_v18  ;;  %v931_v46 = vmul.f32 %v2173_v4, %v1843_v27  ;;  %v986_v25 = vpack.c.bf16 %v926_v34, %v924_v32  ;;  %v985_v8 = vpack.c.bf16 %v925_v61, %v923_v47 }
 0x262   : > { %v932_v18 = vmul.f32 %v2272_v6, %v2001_v38  ;;  %v2304_v42 = vmul.f32 %v2272_v6, %v2087_v58  ;;  %v934_v11 = vmul.f32 %v2272_v6, %v2013_v16  ;;  %v950_v26 = vmul.f32 %v2272_v6, %v2098_v39 }
 0x263   : > { %1026 = vmatprep.subr.bf16.mxu1 %v984_v28  ;;  %v952_v27 = vmul.f32 %v2272_v6, %v2105_v51  ;;  %v954_v47 = vmul.f32 %v2272_v6, %v2111_v54  ;;  %v988_v61 = vpack.c.bf16 %v930_v45, %v928_v5  ;;  %v956_v38 = vmul.f32 %v2272_v6, %v2117_v49 }
 0x264   : > { %1027 = vmatpush1.bf16.msra.mxu1 %v983_v37  ;;  %v958_v58 = vmul.f32 %v2272_v6, %v2123_v43  ;;  %v960_v16 = vmul.f32 %v2272_v6, %v2129_v17  ;;  %v998_v22 = vpack.c.bf16 %v950_v26, %v2304_v42  ;;  %v962_v51 = vmul.f32 %v2272_v6, %v2135_v35  ;;  %v2594_v26 = vld [vmem:[#allocation6_spill] sm:$0xff] }
 0x265   : > { %1028 = vmatprep.subr.bf16.mxu1 %v986_v25  ;;  %v1000_v39 = vpack.c.bf16 %v954_v47, %v952_v27  ;;  %v964_v54 = vmul.f32 %v2272_v6, %v2144_v59  ;;  %v966_v14 = vmul.f32 %v2272_v6, %v2147_v57  ;;  %v968_v49 = vmul.f32 %v2272_v6, %v2153_v3 }
 0x266   : > { %v1002_v25 = vpack.c.bf16 %v958_v58, %v956_v38  ;;  %v970_v43 = vmul.f32 %v2272_v6, %v2159_v36  ;;  %v1004_v17 = vpack.c.bf16 %v962_v51, %v960_v16  ;;  %v972_v2 = vmul.f32 %v2272_v6, %v2162_v29  ;;  %v2600_v58 = vld [vmem:[#allocation12_spill] sm:$0xff]  ;;  %v2603_v16 = vld [vmem:[#allocation15_spill] sm:$0xff]  ;;  %v2611_v51 = vld [vmem:[#allocation9_spill] sm:$0xff] }
 0x267   : > { %v974_v35 = vmul.f32 %v2272_v6, %v2165_v63  ;;  %v976_v59 = vmul.f32 %v2272_v6, %v2168_v52  ;;  %v1006_v32 = vpack.c.bf16 %v966_v14, %v964_v54  ;;  %v978_v3 = vmul.f32 %v2272_v6, %v2170_v10 }
 0x268   : > { %1029 = vmatpush1.bf16.msra.mxu1 %v985_v8  ;;  %v1008_v57 = vpack.c.bf16 %v970_v43, %v968_v49  ;;  %v980_v36 = vmul.f32 %v2272_v6, %v2176_v40  ;;  %v987_v34 = vpack.c.bf16 %v929_v21, %v927_v53  ;;  %v933_v28 = vmul.f32 %v2173_v4, %v1849_v48  ;;  %v2591_v8 = vld [vmem:[#allocation7_spill] sm:$0xff] }
 0x269   : > { %1030 = vmatprep.subr.bf16.mxu1 %v988_v61  ;;  %v1010_v29 = vpack.c.bf16 %v974_v35, %v972_v2  ;;  %v982_v63 = vmul.f32 %v2272_v6, %v2187_v41  ;;  %v990_v5 = vpack.c.bf16 %v934_v11, %v932_v18  ;;  %v936_v52 = vmul.f32 %v2272_v6, %v2025_v62  ;;  %v2592_v18 = vld [vmem:[#allocation8_spill] sm:$0xff]  ;;  %v2597_v61 = vld [vmem:[#allocation10_spill] sm:$0xff] }
 0x26a   : > { %v938_v45 = vmul.f32 %v2272_v6, %v2034_v1  ;;  %v1012_v37 = vpack.c.bf16 %v978_v3, %v976_v59  ;;  %v989_v40 = vpack.c.bf16 %v933_v28, %v931_v46  ;;  %v935_v9 = vmul.f32 %v2173_v4, %v1855_v55 }
 0x26b   : > { %v1014_v10 = vpack.c.bf16 %v982_v63, %v980_v36  ;;  %v937_v48 = vmul.f32 %v2173_v4, %v1864_v0  ;;  %v940_v41 = vmul.f32 %v2272_v6, %v2043_v24  ;;  %v942_v62 = vmul.f32 %v2272_v6, %v2052_v33  ;;  %v2593_v33 = vld [vmem:[#allocation5_spill] sm:$0xff] }
 0x26c   : > { %1031 = vmatpush1.bf16.msra.mxu1 %v987_v34  ;;  %v992_v53 = vpack.c.bf16 %v938_v45, %v936_v52  ;;  %v939_v21 = vmul.f32 %v2173_v4, %v1873_v56  ;;  %v941_v46 = vmul.f32 %v2173_v4, %v1882_v20  ;;  %v944_v0 = vmul.f32 %v2272_v6, %v2591_v8 }
 0x26d   : > { %1032 = vmatprep.subr.bf16.mxu1 %v990_v5  ;;  %v991_v1 = vpack.c.bf16 %v937_v48, %v935_v9  ;;  %v994_v55 = vpack.c.bf16 %v942_v62, %v940_v41  ;;  %v946_v42 = vmul.f32 %v2272_v6, %v2592_v18  ;;  %v943_v11 = vmul.f32 %v2173_v4, %v2593_v33 }
 0x26e   : > { %v993_v24 = vpack.c.bf16 %v941_v46, %v939_v21  ;;  %v945_v27 = vmul.f32 %v2173_v4, %v2594_v26  ;;  %v2595_v47 = vpack.c.bf16 %v2185_v19, %v2181_v15  ;;  %v2596_v6 = vpack.c.bf16 %v2195_v44, %v2191_v50  ;;  %v2601_v15 = vld [vmem:[#allocation11_spill] sm:$0xff]  ;;  %v2604_v50 = vld [vmem:[#allocation13_spill] sm:$0xff] }
 0x26f   : > { %v996_v56 = vpack.c.bf16 %v946_v42, %v944_v0  ;;  %v2598_v38 = vpack.c.bf16 %v2206_v30, %v2597_v61  ;;  %v2599_v4 = vpack.c.bf16 %v2216_v31, %v2212_v13  ;;  %v2602_v19 = vpack.c.bf16 %v2600_v58, %v2601_v15  ;;  %v2607_v30 = vld [vmem:[#allocation16_spill] sm:$0xff] }
 0x270   : > { %1033 = vmatpush1.bf16.msra.mxu1 %v989_v40  ;;  %v995_v20 = vpack.c.bf16 %v945_v27, %v943_v11  ;;  %v2605_v44 = vpack.c.bf16 %v2603_v16, %v2604_v50  ;;  %v2609_v13 = vpack.c.bf16 %v2254_v7, %v2250_v60  ;;  %v2610_v31 = vpack.c.bf16 %v2266_v23, %v2262_v12 }
 0x271   : > { %1034 = vmatprep.subr.bf16.mxu1 %v992_v53 }
 0x274   : > { %1035 = vmatpush1.bf16.msra.mxu1 %v991_v1 }
 0x275   : > { %1036 = vmatprep.subr.bf16.mxu1 %v994_v55 }
 0x278   : > { %1037 = vmatpush1.bf16.msra.mxu1 %v993_v24 }
 0x279   : > { %1038 = vmatprep.subr.bf16.mxu1 %v996_v56 }
 0x27c   : > { %1039 = vmatpush1.bf16.msra.mxu1 %v995_v20 }
 0x27d   : > { %1040 = vmatprep.subr.bf16.mxu1 %v998_v22  ;;  %v2606_v22 = vld [vmem:[#allocation18_spill] sm:$0xff] }
 0x280   : > { %1041 = vmatpush1.bf16.msra.mxu1 %v2595_v47 }
 0x281   : > { %1042 = vmatprep.subr.bf16.mxu1 %v1000_v39  ;;  %v2608_v39 = vpack.c.bf16 %v2606_v22, %v2607_v30 }
 0x284   : > { %1043 = vmatpush1.bf16.msra.mxu1 %v2596_v6 }
 0x285   : > { %1044 = vmatprep.subr.bf16.mxu1 %v1002_v25 }
 0x288   : > { %1045 = vmatpush1.bf16.msra.mxu1 %v2598_v38 }
 0x289   : > { %1046 = vmatprep.subr.bf16.mxu1 %v1004_v17 }
 0x28c   : > { %1047 = vmatpush1.bf16.msra.mxu1 %v2599_v4 }
 0x28d   : > { %1048 = vmatprep.subr.bf16.mxu1 %v1006_v32 }
 0x290   : > { %1049 = vmatpush1.bf16.msra.mxu1 %v2602_v19 }
 0x291   : > { %1050 = vmatprep.subr.bf16.mxu1 %v1008_v57 }
 0x294   : > { %1051 = vmatpush1.bf16.msra.mxu1 %v2605_v44 }
 0x295   : > { %1052 = vmatprep.subr.bf16.mxu1 %v1010_v29 }
 0x298   : > { %1053 = vmatpush1.bf16.msra.mxu1 %v2608_v39 }
 0x299   : > { %1054 = vmatprep.subr.bf16.mxu1 %v1012_v37 }
 0x29c   : > { %1055 = vmatpush1.bf16.msra.mxu1 %v2609_v13 }
 0x29d   : > { %1056 = vmatprep.subr.bf16.mxu1 %v1014_v10 }
 0x2a0   : > { %1057 = vmatpush1.bf16.msra.mxu1 %v2610_v31 }
 0x2a3   : > { %1059 = vmatmul.mubr.bf16.vlgmr.msra.gmra.mrb[0].mxu1 %v2611_v51 }
 0x376   : > { %v1060_v54 = vpop.f32.mrb[0].mxu1 }
 0x377   : > { %v1062_v25 = vpop.f32.mrb[1].mxu1 }
 0x378   : > { %v1226_v14 = vpack.c.bf16 %v1062_v25, %v1060_v54  ;;  %v1064_v49 = vpop.f32.mrb[2].mxu1 }
 0x379   : > { %v1065_v43 = vpop.f32.mrb[3].mxu1 }
 0x37a   : > { %1227 = vst.sshfl [vmem:[%s242_s29] sm:$0x33 pattern:$0x76325410] %v1226_v14 }
 0x37b PF: > { %s13_s14 = sadd.s32 1, %s1412_s14   ;;  %s2612_s12 = smov %s1408_s13 }
 0x37c   : > { %p10_p5 = scmp.ge.s32.totalorder %s13_s14, 4   ;;  %s2613_s13 = smov %s2615_s15 }
 0x37e   :  { %12 = sbr.rel (!%p10_p5) target bundleno = 2 (0x2), region = 68 }

</bundles_post_ra>
